<compile_context>
chip_gen: v7x
topology: tpu7x:2x2x1
jax: 0.10.0
libtpu: 0.0.40
codegen_flags: <defaults>
</compile_context>

<pallas_src>
import functools

import jax
import jax.numpy as jnp
from jax.experimental import pallas as pl
from jax.experimental.pallas import tpu as pltpu

BN_EPS = 1e-5
LANE = 128


def _round_up(n, m):
    return ((n + m - 1) // m) * m


def malware_classifier_kernel(x_ref, params_ref, o_ref, *, width, num_classes):
    """Fused fc->bn (->relu) x4 -> log-softmax, everything padded to `width` lanes.

    params_ref layout (rows, all zero-padded to `width` columns):
      [0*W : 1*W]  w1   [1*W : 2*W]  w2   [2*W : 3*W]  w3   [3*W : 4*W]  w4
      [4*W + 2i]   gamma_i      [4*W + 2i + 1]  beta_i      (i = 0..3)
    Padded features carry gamma = beta = 0 and zero weight rows/cols, so they
    stay exactly zero through every layer.
    """
    W = width

    def bn_row(row):
        return params_ref[4 * W + row: 4 * W + row + 1, :]

    def layer(h, idx, relu):
        w = params_ref[idx * W:(idx + 1) * W, :]            # static slice: free
        # Linear bias omitted: exactly cancelled by the batch-mean subtraction.
        y = jnp.dot(h, w, preferred_element_type=jnp.float32)
        gamma = bn_row(2 * idx)
        beta = bn_row(2 * idx + 1)
        mean = jnp.mean(y, axis=0, keepdims=True)
        centered = y - mean
        var = jnp.mean(centered * centered, axis=0, keepdims=True)
        scale = gamma * jax.lax.rsqrt(var + BN_EPS)          # hoisted scale/shift
        out = centered * scale + beta
        if relu:
            out = jnp.maximum(out, 0.0)
        return out

    h = x_ref[...]
    h = layer(h, 0, relu=True)    # fc1 -> bn1 -> relu
    h = layer(h, 1, relu=False)   # fc2 -> bn2
    h = layer(h, 2, relu=False)   # fc3 -> bn3
    h = layer(h, 3, relu=False)   # fc4 -> bn4

    # log-softmax over the logical num_classes lanes only (padded lanes masked
    # out of the max / sum; their stored values are garbage and sliced away by
    # the caller, keeping the store lane-dense).
    lane = jax.lax.broadcasted_iota(jnp.int32, (1, W), 1)
    valid = lane < num_classes
    m = jnp.max(jnp.where(valid, h, -jnp.inf), axis=1, keepdims=True)
    e = jnp.where(valid, jnp.exp(h - m), 0.0)
    lse = jnp.log(jnp.sum(e, axis=1, keepdims=True))
    o_ref[...] = h - m - lse


def malware_classifier_forward(x, params, *, width, num_classes):
    """x: [batch, input_size] f32; params: [4*width + 8, width] packed slab."""
    batch, in_dim = x.shape
    x_p = jnp.pad(x, ((0, 0), (0, width - in_dim)))          # lane-pad the input

    vmem = pl.BlockSpec(memory_space=pltpu.MemorySpace.VMEM)
    kernel = functools.partial(
        malware_classifier_kernel, width=width, num_classes=num_classes)

    out = pl.pallas_call(
        kernel,
        out_shape=jax.ShapeDtypeStruct((batch, width), jnp.float32),
        in_specs=[vmem, vmem],
        out_specs=vmem,
    )(x_p, params)
    return out[:, :num_classes]


def init_params(key, input_size, hidden_size, num_classes):
    """PyTorch Linear-style uniform init; BN gamma=1, beta=0.

    Returns (weights, biases, gammas, betas). Biases are created for fidelity
    with the PyTorch module but are NOT passed to the kernel (training-mode BN
    cancels them exactly).
    """
    dims = [
        (input_size, hidden_size),
        (hidden_size, hidden_size // 2),
        (hidden_size // 2, hidden_size // 4),
        (hidden_size // 4, num_classes),
    ]
    weights, biases, gammas, betas = [], [], [], []
    for (fan_in, fan_out) in dims:
        key, kw, kb = jax.random.split(key, 3)
        bound = 1.0 / jnp.sqrt(jnp.float32(fan_in))
        weights.append(jax.random.uniform(kw, (fan_in, fan_out), jnp.float32, -bound, bound))
        biases.append(jax.random.uniform(kb, (fan_out,), jnp.float32, -bound, bound))
        gammas.append(jnp.ones((fan_out,), jnp.float32))
        betas.append(jnp.zeros((fan_out,), jnp.float32))
    return tuple(weights), tuple(biases), tuple(gammas), tuple(betas)


def pack_params(weights, gammas, betas, width):
    """Pack w1..w4 and the BN gamma/beta rows into one zero-padded [4W+8, W] slab."""
    W = width
    slab = jnp.zeros((4 * W + 8, W), jnp.float32)
    for i, w in enumerate(weights):
        slab = slab.at[i * W:i * W + w.shape[0], :w.shape[1]].set(w)
    for i, (g, b) in enumerate(zip(gammas, betas)):
        slab = slab.at[4 * W + 2 * i, :g.shape[0]].set(g)
        slab = slab.at[4 * W + 2 * i + 1, :b.shape[0]].set(b)
    return slab


def reference_forward(x, weights, biases, gammas, betas):
    """Pure-JAX reference matching the PyTorch module (training-mode BN, with bias)."""
    def bn(y, g, b):
        mean = jnp.mean(y, axis=0, keepdims=True)
        var = jnp.mean((y - mean) ** 2, axis=0, keepdims=True)
        return (y - mean) * jax.lax.rsqrt(var + BN_EPS) * g + b

    h = x
    for i, (w, bi, g, be) in enumerate(zip(weights, biases, gammas, betas)):
        h = bn(h @ w + bi, g, be)
        if i == 0:
            h = jnp.maximum(h, 0.0)
    return jax.nn.log_softmax(h, axis=1)


if __name__ == "__main__":
    input_size = 32
    hidden_size = 32      # -> layer widths 32, 16, 8
    num_classes = 5
    batch = 128           # amortize per-call launch/DMA overhead (per review)

    width = max(LANE, _round_up(max(input_size, hidden_size, num_classes), LANE))

    key = jax.random.PRNGKey(0)
    key, kx = jax.random.split(key)
    x = jax.random.normal(kx, (batch, input_size), jnp.float32)

    weights, biases, gammas, betas = init_params(key, input_size, hidden_size, num_classes)
    params = pack_params(weights, gammas, betas, width)

    fwd = jax.jit(functools.partial(
        malware_classifier_forward, width=width, num_classes=num_classes))
    out = fwd(x, params)
    jax.block_until_ready(out)

    assert out.shape == (batch, num_classes)

    # sanity 1: log-softmax rows should logsumexp to ~0
    row_lse = jax.scipy.special.logsumexp(out, axis=1)
    assert bool(jnp.all(jnp.abs(row_lse) < 1e-4))

    # sanity 2: matches the pure-JAX PyTorch-equivalent reference (with biases)
    ref = reference_forward(x, weights, biases, gammas, betas)
    assert bool(jnp.all(jnp.abs(out - ref) < 1e-3))

    print("KERNEL_OK")
</pallas_src>

<mosaic_0001>
module attributes {stable_mosaic.version = 11 : i64} {
  func.func @malware_classifier_kernel(%arg0: memref<128x128xf32, #tpu.memory_space<vmem>>, %arg1: memref<520x128xf32, #tpu.memory_space<vmem>>, %arg2: memref<128x128xf32, #tpu.memory_space<vmem>>) attributes {dimension_semantics = [], scalar_prefetch = 0 : i64, scratch_operands = 0 : i64, tpu.core_type = #tpu.core_type<tc>} {
    %c0 = arith.constant 0 : index
    %c0_0 = arith.constant 0 : index
    %0 = vector.load %arg0[%c0, %c0_0] : memref<128x128xf32, #tpu.memory_space<vmem>>, vector<128x128xf32>
    %c0_1 = arith.constant 0 : index
    %c0_2 = arith.constant 0 : index
    %1 = vector.load %arg1[%c0_1, %c0_2] : memref<520x128xf32, #tpu.memory_space<vmem>>, vector<128x128xf32>
    %cst = arith.constant dense<0.000000e+00> : vector<128x128xf32>
    %2 = tpu.matmul %0, %1, %cst {dimension_numbers = #tpu.dot_dimension_numbers<[1], [0], [0], [1], [0, 0, 1, 1], [], []>} : vector<128x128xf32>, vector<128x128xf32>, vector<128x128xf32> -> vector<128x128xf32>
    %c512 = arith.constant 512 : index
    %c0_3 = arith.constant 0 : index
    %3 = vector.load %arg1[%c512, %c0_3] : memref<520x128xf32, #tpu.memory_space<vmem>>, vector<1x128xf32>
    %c513 = arith.constant 513 : index
    %c0_4 = arith.constant 0 : index
    %4 = vector.load %arg1[%c513, %c0_4] : memref<520x128xf32, #tpu.memory_space<vmem>>, vector<1x128xf32>
    %cst_5 = arith.constant dense<0.000000e+00> : vector<128xf32>
    %5 = vector.multi_reduction <add>, %2, %cst_5 [0] : vector<128x128xf32> to vector<128xf32>
    %6 = vector.shape_cast %5 : vector<128xf32> to vector<1x128xf32>
    %cst_6 = arith.constant 1.280000e+02 : f32
    %7 = vector.broadcast %cst_6 : f32 to vector<1x128xf32>
    %8 = arith.divf %6, %7 : vector<1x128xf32>
    %9 = vector.broadcast %8 : vector<1x128xf32> to vector<128x128xf32>
    %10 = arith.subf %2, %9 : vector<128x128xf32>
    %11 = arith.mulf %10, %10 : vector<128x128xf32>
    %cst_7 = arith.constant dense<0.000000e+00> : vector<128xf32>
    %12 = vector.multi_reduction <add>, %11, %cst_7 [0] : vector<128x128xf32> to vector<128xf32>
    %13 = vector.shape_cast %12 : vector<128xf32> to vector<1x128xf32>
    %cst_8 = arith.constant 1.280000e+02 : f32
    %14 = vector.broadcast %cst_8 : f32 to vector<1x128xf32>
    %15 = arith.divf %13, %14 : vector<1x128xf32>
    %cst_9 = arith.constant 9.99999974E-6 : f32
    %16 = vector.broadcast %cst_9 : f32 to vector<1x128xf32>
    %17 = arith.addf %15, %16 : vector<1x128xf32>
    %18 = math.rsqrt %17 : vector<1x128xf32>
    %19 = arith.mulf %3, %18 : vector<1x128xf32>
    %20 = vector.broadcast %19 : vector<1x128xf32> to vector<128x128xf32>
    %21 = arith.mulf %10, %20 : vector<128x128xf32>
    %22 = vector.broadcast %4 : vector<1x128xf32> to vector<128x128xf32>
    %23 = arith.addf %21, %22 : vector<128x128xf32>
    %cst_10 = arith.constant 0.000000e+00 : f32
    %24 = vector.broadcast %cst_10 : f32 to vector<128x128xf32>
    %25 = arith.maximumf %23, %24 : vector<128x128xf32>
    %c128 = arith.constant 128 : index
    %c0_11 = arith.constant 0 : index
    %26 = vector.load %arg1[%c128, %c0_11] : memref<520x128xf32, #tpu.memory_space<vmem>>, vector<128x128xf32>
    %cst_12 = arith.constant dense<0.000000e+00> : vector<128x128xf32>
    %27 = tpu.matmul %25, %26, %cst_12 {dimension_numbers = #tpu.dot_dimension_numbers<[1], [0], [0], [1], [0, 0, 1, 1], [], []>} : vector<128x128xf32>, vector<128x128xf32>, vector<128x128xf32> -> vector<128x128xf32>
    %c514 = arith.constant 514 : index
    %c0_13 = arith.constant 0 : index
    %28 = vector.load %arg1[%c514, %c0_13] : memref<520x128xf32, #tpu.memory_space<vmem>>, vector<1x128xf32>
    %c515 = arith.constant 515 : index
    %c0_14 = arith.constant 0 : index
    %29 = vector.load %arg1[%c515, %c0_14] : memref<520x128xf32, #tpu.memory_space<vmem>>, vector<1x128xf32>
    %cst_15 = arith.constant dense<0.000000e+00> : vector<128xf32>
    %30 = vector.multi_reduction <add>, %27, %cst_15 [0] : vector<128x128xf32> to vector<128xf32>
    %31 = vector.shape_cast %30 : vector<128xf32> to vector<1x128xf32>
    %cst_16 = arith.constant 1.280000e+02 : f32
    %32 = vector.broadcast %cst_16 : f32 to vector<1x128xf32>
    %33 = arith.divf %31, %32 : vector<1x128xf32>
    %34 = vector.broadcast %33 : vector<1x128xf32> to vector<128x128xf32>
    %35 = arith.subf %27, %34 : vector<128x128xf32>
    %36 = arith.mulf %35, %35 : vector<128x128xf32>
    %cst_17 = arith.constant dense<0.000000e+00> : vector<128xf32>
    %37 = vector.multi_reduction <add>, %36, %cst_17 [0] : vector<128x128xf32> to vector<128xf32>
    %38 = vector.shape_cast %37 : vector<128xf32> to vector<1x128xf32>
    %cst_18 = arith.constant 1.280000e+02 : f32
    %39 = vector.broadcast %cst_18 : f32 to vector<1x128xf32>
    %40 = arith.divf %38, %39 : vector<1x128xf32>
    %cst_19 = arith.constant 9.99999974E-6 : f32
    %41 = vector.broadcast %cst_19 : f32 to vector<1x128xf32>
    %42 = arith.addf %40, %41 : vector<1x128xf32>
    %43 = math.rsqrt %42 : vector<1x128xf32>
    %44 = arith.mulf %28, %43 : vector<1x128xf32>
    %45 = vector.broadcast %44 : vector<1x128xf32> to vector<128x128xf32>
    %46 = arith.mulf %35, %45 : vector<128x128xf32>
    %47 = vector.broadcast %29 : vector<1x128xf32> to vector<128x128xf32>
    %48 = arith.addf %46, %47 : vector<128x128xf32>
    %c256 = arith.constant 256 : index
    %c0_20 = arith.constant 0 : index
    %49 = vector.load %arg1[%c256, %c0_20] : memref<520x128xf32, #tpu.memory_space<vmem>>, vector<128x128xf32>
    %cst_21 = arith.constant dense<0.000000e+00> : vector<128x128xf32>
    %50 = tpu.matmul %48, %49, %cst_21 {dimension_numbers = #tpu.dot_dimension_numbers<[1], [0], [0], [1], [0, 0, 1, 1], [], []>} : vector<128x128xf32>, vector<128x128xf32>, vector<128x128xf32> -> vector<128x128xf32>
    %c516 = arith.constant 516 : index
    %c0_22 = arith.constant 0 : index
    %51 = vector.load %arg1[%c516, %c0_22] : memref<520x128xf32, #tpu.memory_space<vmem>>, vector<1x128xf32>
    %c517 = arith.constant 517 : index
    %c0_23 = arith.constant 0 : index
    %52 = vector.load %arg1[%c517, %c0_23] : memref<520x128xf32, #tpu.memory_space<vmem>>, vector<1x128xf32>
    %cst_24 = arith.constant dense<0.000000e+00> : vector<128xf32>
    %53 = vector.multi_reduction <add>, %50, %cst_24 [0] : vector<128x128xf32> to vector<128xf32>
    %54 = vector.shape_cast %53 : vector<128xf32> to vector<1x128xf32>
    %cst_25 = arith.constant 1.280000e+02 : f32
    %55 = vector.broadcast %cst_25 : f32 to vector<1x128xf32>
    %56 = arith.divf %54, %55 : vector<1x128xf32>
    %57 = vector.broadcast %56 : vector<1x128xf32> to vector<128x128xf32>
    %58 = arith.subf %50, %57 : vector<128x128xf32>
    %59 = arith.mulf %58, %58 : vector<128x128xf32>
    %cst_26 = arith.constant dense<0.000000e+00> : vector<128xf32>
    %60 = vector.multi_reduction <add>, %59, %cst_26 [0] : vector<128x128xf32> to vector<128xf32>
    %61 = vector.shape_cast %60 : vector<128xf32> to vector<1x128xf32>
    %cst_27 = arith.constant 1.280000e+02 : f32
    %62 = vector.broadcast %cst_27 : f32 to vector<1x128xf32>
    %63 = arith.divf %61, %62 : vector<1x128xf32>
    %cst_28 = arith.constant 9.99999974E-6 : f32
    %64 = vector.broadcast %cst_28 : f32 to vector<1x128xf32>
    %65 = arith.addf %63, %64 : vector<1x128xf32>
    %66 = math.rsqrt %65 : vector<1x128xf32>
    %67 = arith.mulf %51, %66 : vector<1x128xf32>
    %68 = vector.broadcast %67 : vector<1x128xf32> to vector<128x128xf32>
    %69 = arith.mulf %58, %68 : vector<128x128xf32>
    %70 = vector.broadcast %52 : vector<1x128xf32> to vector<128x128xf32>
    %71 = arith.addf %69, %70 : vector<128x128xf32>
    %c384 = arith.constant 384 : index
    %c0_29 = arith.constant 0 : index
    %72 = vector.load %arg1[%c384, %c0_29] : memref<520x128xf32, #tpu.memory_space<vmem>>, vector<128x128xf32>
    %cst_30 = arith.constant dense<0.000000e+00> : vector<128x128xf32>
    %73 = tpu.matmul %71, %72, %cst_30 {dimension_numbers = #tpu.dot_dimension_numbers<[1], [0], [0], [1], [0, 0, 1, 1], [], []>} : vector<128x128xf32>, vector<128x128xf32>, vector<128x128xf32> -> vector<128x128xf32>
    %c518 = arith.constant 518 : index
    %c0_31 = arith.constant 0 : index
    %74 = vector.load %arg1[%c518, %c0_31] : memref<520x128xf32, #tpu.memory_space<vmem>>, vector<1x128xf32>
    %c519 = arith.constant 519 : index
    %c0_32 = arith.constant 0 : index
    %75 = vector.load %arg1[%c519, %c0_32] : memref<520x128xf32, #tpu.memory_space<vmem>>, vector<1x128xf32>
    %cst_33 = arith.constant dense<0.000000e+00> : vector<128xf32>
    %76 = vector.multi_reduction <add>, %73, %cst_33 [0] : vector<128x128xf32> to vector<128xf32>
    %77 = vector.shape_cast %76 : vector<128xf32> to vector<1x128xf32>
    %cst_34 = arith.constant 1.280000e+02 : f32
    %78 = vector.broadcast %cst_34 : f32 to vector<1x128xf32>
    %79 = arith.divf %77, %78 : vector<1x128xf32>
    %80 = vector.broadcast %79 : vector<1x128xf32> to vector<128x128xf32>
    %81 = arith.subf %73, %80 : vector<128x128xf32>
    %82 = arith.mulf %81, %81 : vector<128x128xf32>
    %cst_35 = arith.constant dense<0.000000e+00> : vector<128xf32>
    %83 = vector.multi_reduction <add>, %82, %cst_35 [0] : vector<128x128xf32> to vector<128xf32>
    %84 = vector.shape_cast %83 : vector<128xf32> to vector<1x128xf32>
    %cst_36 = arith.constant 1.280000e+02 : f32
    %85 = vector.broadcast %cst_36 : f32 to vector<1x128xf32>
    %86 = arith.divf %84, %85 : vector<1x128xf32>
    %cst_37 = arith.constant 9.99999974E-6 : f32
    %87 = vector.broadcast %cst_37 : f32 to vector<1x128xf32>
    %88 = arith.addf %86, %87 : vector<1x128xf32>
    %89 = math.rsqrt %88 : vector<1x128xf32>
    %90 = arith.mulf %74, %89 : vector<1x128xf32>
    %91 = vector.broadcast %90 : vector<1x128xf32> to vector<128x128xf32>
    %92 = arith.mulf %81, %91 : vector<128x128xf32>
    %93 = vector.broadcast %75 : vector<1x128xf32> to vector<128x128xf32>
    %94 = arith.addf %92, %93 : vector<128x128xf32>
    %95 = tpu.iota {dimensions = array<i32: 1>} : vector<1x128xi32>
    %c5_i32 = arith.constant 5 : i32
    %96 = vector.broadcast %c5_i32 : i32 to vector<1x128xi32>
    %97 = arith.cmpi slt, %95, %96 : vector<1x128xi32>
    %cst_38 = arith.constant 0xFF800000 : f32
    %98 = vector.shape_cast %97 : vector<1x128xi1> to vector<1x128xi1>
    %99 = vector.broadcast %98 : vector<1x128xi1> to vector<128x128xi1>
    %100 = vector.broadcast %cst_38 : f32 to vector<128x128xf32>
    %101 = arith.select %99, %94, %100 : vector<128x128xi1>, vector<128x128xf32>
    %cst_39 = arith.constant dense<0xFF800000> : vector<128xf32>
    %102 = vector.multi_reduction <maximumf>, %101, %cst_39 [1] : vector<128x128xf32> to vector<128xf32>
    %103 = vector.shape_cast %102 : vector<128xf32> to vector<128x1xf32>
    %104 = vector.broadcast %103 : vector<128x1xf32> to vector<128x128xf32>
    %105 = arith.subf %94, %104 : vector<128x128xf32>
    %106 = math.exp %105 : vector<128x128xf32>
    %cst_40 = arith.constant 0.000000e+00 : f32
    %107 = vector.shape_cast %97 : vector<1x128xi1> to vector<1x128xi1>
    %108 = vector.broadcast %107 : vector<1x128xi1> to vector<128x128xi1>
    %109 = vector.broadcast %cst_40 : f32 to vector<128x128xf32>
    %110 = arith.select %108, %106, %109 : vector<128x128xi1>, vector<128x128xf32>
    %cst_41 = arith.constant dense<0.000000e+00> : vector<128xf32>
    %111 = vector.multi_reduction <add>, %110, %cst_41 [1] : vector<128x128xf32> to vector<128xf32>
    %112 = vector.shape_cast %111 : vector<128xf32> to vector<128x1xf32>
    %113 = math.log %112 : vector<128x1xf32>
    %114 = vector.broadcast %103 : vector<128x1xf32> to vector<128x128xf32>
    %115 = arith.subf %94, %114 : vector<128x128xf32>
    %116 = vector.broadcast %113 : vector<128x1xf32> to vector<128x128xf32>
    %117 = arith.subf %115, %116 : vector<128x128xf32>
    %c0_42 = arith.constant 0 : index
    %c0_43 = arith.constant 0 : index
    %118 = vector.load %arg2[%c0_42, %c0_43] : memref<128x128xf32, #tpu.memory_space<vmem>>, vector<128x128xf32>
    tpu.vector_store %arg2[%c0_42, %c0_43], %117 {strides = array<i32>} : memref<128x128xf32, #tpu.memory_space<vmem>>, vector<128x128xf32>,
    return
  }
}

</mosaic_0001>

<bundles_post_ra>
// kernel: malware_classifier_forward.1
= control target key start
LH: loop header
LB: loop body
LE: loop exit
PB: predicated region body
PF: predicated region fallthrough
CT: control target
= control target key end

     0   :  { %7 = vsyncpa [#allocation3], 0  ;;  %s1987_s9 = smov [#allocation2]   ;;  %s2491_s0 = inlined_call_operand.vmem [shape: f32[128,128], index: 0, kind: input, shape index: {}]   ;;  %s2492_s1 = inlined_call_operand.hbm [shape: f32[520,128], index: 1, kind: input, shape index: {}]   ;;  %s2493_s2 = inlined_call_operand.vmem [shape: f32[128,128], index: 2, kind: output, shape index: {}]  }
   0x1   :  { %s15_s10 = sshll.u32 %s1987_s9, 4  ;;  %s1963_s13 = scalar_lea.hbm %s2492_s1, 8320  ;;  %s16_s10 = int_to_ptr.vmem [resolvable:$true] %s15_s10 }
   0x2   :  { %p1964_p0 = scmp.ne.s32.totalorder %s2492_s1, %s1963_s13  ;;  %p1967_p1 = scmp.lt.u32.totalorder %s1963_s13, %s2492_s1 }
   0x4   :  { %p1969_p2 = pnand %p1967_p1, %p1964_p0 }
   0x6   :  { %1972 = shalt.err (!%p1969_p2)
}
   0x7   :  { %s1973_s18 = scalar_lea.vmem %s16_s10, 8320  ;;  %p1978_p4 = scmp.lt.s32.totalorder %s16_s10, %s16_s10 }
   0x8   :  { %p1974_p3 = scmp.ne.s32.totalorder %s16_s10, %s1973_s18  ;;  %p1979_p5 = scmp.lt.s32.totalorder %s1973_s18, %s1973_s18 }
   0xa   :  { %p1980_p6 = por %p1979_p5, %p1978_p4 }
   0xc   :  { %p1981_p7 = pnand %p1980_p6, %p1974_p3 }
   0xe   :  { %1984 = shalt.err (!%p1981_p7)
}
   0xf   :  { %s1988_s19 = smov 128   ;;  %s1989_s20 = smov 8  }
  0x10   :  { %21 = dma.hbm_to_vmem [thread:$0]  %s2492_s1, 8320, %s16_s10, [#allocation3], %s1988_s19, %s1988_s19, %s1989_s20  }
  0x11   :  { %1985 = dma.done.wait [#allocation3], 8320  }
  0x12   :  { %1986 = vsyncadd [#allocation3], 4294958976  ;;  %v41_v0 = vld [vmem:[#allocation2] sm:$0xff]  ;;  %v42_v1 = vld [vmem:[#allocation2 + $0x8] sm:$0xff] }
  0x13   :  { %v43_v2 = vld [vmem:[#allocation2 + $0x10] sm:$0xff]  ;;  %v1760_v3 = vpack.c.bf16 %v42_v1, %v41_v0  ;;  %v44_v4 = vld [vmem:[#allocation2 + $0x18] sm:$0xff]  ;;  %v45_v6 = vld [vmem:[#allocation2 + $0x20] sm:$0xff] }
  0x14   :  { %v1764_v5 = vpack.c.bf16 %v44_v4, %v43_v2  ;;  %v46_v7 = vld [vmem:[#allocation2 + $0x28] sm:$0xff]  ;;  %v25_v9 = vld [vmem:[%s2491_s0] sm:$0xff]  ;;  %v47_v10 = vld [vmem:[#allocation2 + $0x30] sm:$0xff] }
  0x15   :  { %1761 = vmatprep.subr.bf16.mxu0 %v1760_v3  ;;  %v1768_v8 = vpack.c.bf16 %v46_v7, %v45_v6  ;;  %v48_v11 = vld [vmem:[#allocation2 + $0x38] sm:$0xff]  ;;  %1568 = vmatprep.mubr.f32.mxu0 %v25_v9  ;;  %v49_v13 = vld [vmem:[#allocation2 + $0x40] sm:$0xff]  ;;  %v50_v14 = vld [vmem:[#allocation2 + $0x48] sm:$0xff] }
  0x16   :  { %1763 = vmatpush3.bf16.msra.mxu0 %v1760_v3  ;;  %v1772_v12 = vpack.c.bf16 %v48_v11, %v47_v10  ;;  %v1776_v15 = vpack.c.bf16 %v50_v14, %v49_v13  ;;  %v51_v16 = vld [vmem:[#allocation2 + $0x50] sm:$0xff]  ;;  %v52_v17 = vld [vmem:[#allocation2 + $0x58] sm:$0xff]  ;;  %v53_v19 = vld [vmem:[#allocation2 + $0x60] sm:$0xff] }
  0x17   :  { %1765 = vmatprep.subr.bf16.mxu0 %v1764_v5  ;;  %v1780_v18 = vpack.c.bf16 %v52_v17, %v51_v16  ;;  %v54_v20 = vld [vmem:[#allocation2 + $0x68] sm:$0xff]  ;;  %v55_v22 = vld [vmem:[#allocation2 + $0x70] sm:$0xff]  ;;  %v56_v23 = vld [vmem:[#allocation2 + $0x78] sm:$0xff] }
  0x18   :  { %v1784_v21 = vpack.c.bf16 %v54_v20, %v53_v19  ;;  %v1788_v24 = vpack.c.bf16 %v56_v23, %v55_v22  ;;  %v26_v25 = vld [vmem:[%s2491_s0 + $0x8] sm:$0xff]  ;;  %v27_v26 = vld [vmem:[%s2491_s0 + $0x10] sm:$0xff]  ;;  %v28_v27 = vld [vmem:[%s2491_s0 + $0x18] sm:$0xff] }
  0x19   :  { %v29_v28 = vld [vmem:[%s2491_s0 + $0x20] sm:$0xff]  ;;  %v30_v29 = vld [vmem:[%s2491_s0 + $0x28] sm:$0xff]  ;;  %v31_v30 = vld [vmem:[%s2491_s0 + $0x30] sm:$0xff] }
  0x1a   :  { %1767 = vmatpush3.bf16.msra.mxu0 %v1764_v5  ;;  %v32_v31 = vld [vmem:[%s2491_s0 + $0x38] sm:$0xff]  ;;  %v33_v32 = vld [vmem:[%s2491_s0 + $0x40] sm:$0xff]  ;;  %v34_v33 = vld [vmem:[%s2491_s0 + $0x48] sm:$0xff] }
  0x1b   :  { %1769 = vmatprep.subr.bf16.mxu0 %v1768_v8  ;;  %v35_v34 = vld [vmem:[%s2491_s0 + $0x50] sm:$0xff]  ;;  %v36_v35 = vld [vmem:[%s2491_s0 + $0x58] sm:$0xff]  ;;  %v37_v36 = vld [vmem:[%s2491_s0 + $0x60] sm:$0xff] }
  0x1c   :  { %v38_v37 = vld [vmem:[%s2491_s0 + $0x68] sm:$0xff]  ;;  %v39_v38 = vld [vmem:[%s2491_s0 + $0x70] sm:$0xff]  ;;  %v40_v39 = vld [vmem:[%s2491_s0 + $0x78] sm:$0xff] }
  0x1d   :  { %v340_v40 = vld [vmem:[#allocation2 + $0x80] sm:$0xff]  ;;  %v341_v41 = vld [vmem:[#allocation2 + $0x88] sm:$0xff]  ;;  %v342_v43 = vld [vmem:[#allocation2 + $0x90] sm:$0xff] }
  0x1e   :  { %1771 = vmatpush3.bf16.msra.mxu0 %v1768_v8  ;;  %v1792_v42 = vpack.c.bf16 %v341_v41, %v340_v40  ;;  %v343_v44 = vld [vmem:[#allocation2 + $0x98] sm:$0xff]  ;;  %v344_v46 = vld [vmem:[#allocation2 + $0xa0] sm:$0xff]  ;;  %v345_v47 = vld [vmem:[#allocation2 + $0xa8] sm:$0xff] }
  0x1f   :  { %1773 = vmatprep.subr.bf16.mxu0 %v1772_v12  ;;  %v1796_v45 = vpack.c.bf16 %v343_v44, %v342_v43  ;;  %v1800_v48 = vpack.c.bf16 %v345_v47, %v344_v46  ;;  %v346_v49 = vld [vmem:[#allocation2 + $0xb0] sm:$0xff]  ;;  %v347_v50 = vld [vmem:[#allocation2 + $0xb8] sm:$0xff]  ;;  %v348_v52 = vld [vmem:[#allocation2 + $0xc0] sm:$0xff] }
  0x20   :  { %1793 = vmatprep.subr.bf16.mxu1 %v1792_v42  ;;  %v1804_v51 = vpack.c.bf16 %v347_v50, %v346_v49  ;;  %v349_v53 = vld [vmem:[#allocation2 + $0xc8] sm:$0xff]  ;;  %v350_v55 = vld [vmem:[#allocation2 + $0xd0] sm:$0xff]  ;;  %v351_v56 = vld [vmem:[#allocation2 + $0xd8] sm:$0xff] }
  0x21   :  { %1795 = vmatpush3.bf16.msra.mxu1 %v1792_v42  ;;  %v1808_v54 = vpack.c.bf16 %v349_v53, %v348_v52  ;;  %v1812_v57 = vpack.c.bf16 %v351_v56, %v350_v55  ;;  %v352_v58 = vld [vmem:[#allocation2 + $0xe0] sm:$0xff]  ;;  %v353_v59 = vld [vmem:[#allocation2 + $0xe8] sm:$0xff]  ;;  %v354_v61 = vld [vmem:[#allocation2 + $0xf0] sm:$0xff] }
  0x22   :  { %1775 = vmatpush3.bf16.msra.mxu0 %v1772_v12  ;;  %1797 = vmatprep.subr.bf16.mxu1 %v1796_v45  ;;  %v1816_v60 = vpack.c.bf16 %v353_v59, %v352_v58  ;;  %v355_v62 = vld [vmem:[#allocation2 + $0xf8] sm:$0xff] }
  0x23   :  { %1777 = vmatprep.subr.bf16.mxu0 %v1776_v15  ;;  %v1820_v63 = vpack.c.bf16 %v355_v62, %v354_v61 }
  0x25   :  { %1799 = vmatpush3.bf16.msra.mxu1 %v1796_v45 }
  0x26   :  { %1779 = vmatpush3.bf16.msra.mxu0 %v1776_v15  ;;  %1801 = vmatprep.subr.bf16.mxu1 %v1800_v48 }
  0x27   :  { %1781 = vmatprep.subr.bf16.mxu0 %v1780_v18 }
  0x29   :  { %1803 = vmatpush3.bf16.msra.mxu1 %v1800_v48 }
  0x2a   :  { %1783 = vmatpush3.bf16.msra.mxu0 %v1780_v18  ;;  %1805 = vmatprep.subr.bf16.mxu1 %v1804_v51 }
  0x2b   :  { %1785 = vmatprep.subr.bf16.mxu0 %v1784_v21 }
  0x2d   :  { %1807 = vmatpush3.bf16.msra.mxu1 %v1804_v51 }
  0x2e   :  { %1787 = vmatpush3.bf16.msra.mxu0 %v1784_v21  ;;  %1809 = vmatprep.subr.bf16.mxu1 %v1808_v54 }
  0x2f   :  { %1789 = vmatprep.subr.bf16.mxu0 %v1788_v24 }
  0x31   :  { %1811 = vmatpush3.bf16.msra.mxu1 %v1808_v54 }
  0x32   :  { %1791 = vmatpush3.bf16.msra.mxu0 %v1788_v24  ;;  %1813 = vmatprep.subr.bf16.mxu1 %v1812_v57 }
  0x35   :  { %1569 = vmatmul.mubr.f32.vlgmr.msra.gmra.mrb[0].mxu0 %v26_v25  ;;  %1815 = vmatpush3.bf16.msra.mxu1 %v1812_v57 }
  0x36   :  { %1571 = vmatprep.mubr.f32.mxu0 %v27_v26  ;;  %1817 = vmatprep.subr.bf16.mxu1 %v1816_v60 }
  0x39   :  { %1572 = vmatmul.mubr.f32.gmra.mrb[2].mxu0 %v28_v27  ;;  %1819 = vmatpush3.bf16.msra.mxu1 %v1816_v60 }
  0x3a   :  { %1574 = vmatprep.mubr.f32.mxu0 %v29_v28  ;;  %1821 = vmatprep.subr.bf16.mxu1 %v1820_v63 }
  0x3d   :  { %1575 = vmatmul.mubr.f32.gmra.mrb[4].mxu0 %v30_v29  ;;  %1823 = vmatpush3.bf16.msra.mxu1 %v1820_v63 }
  0x3e   :  { %1577 = vmatprep.mubr.f32.mxu0 %v31_v30 }
  0x41   :  { %1578 = vmatmul.mubr.f32.gmra.mrb[6].mxu0 %v32_v31 }
  0x42   :  { %1580 = vmatprep.mubr.f32.mxu0 %v33_v32 }
  0x45   :  { %1581 = vmatmul.mubr.f32.gmra.mrb[8].mxu0 %v34_v33 }
  0x46   :  { %1583 = vmatprep.mubr.f32.mxu0 %v35_v34 }
  0x49   :  { %1584 = vmatmul.mubr.f32.gmra.mrb[10].mxu0 %v36_v35 }
  0x4a   :  { %1586 = vmatprep.mubr.f32.mxu0 %v37_v36 }
  0x4d   :  { %1587 = vmatmul.mubr.f32.gmra.mrb[12].mxu0 %v38_v37 }
  0x4e   :  { %1589 = vmatprep.mubr.f32.mxu0 %v39_v38 }
  0x51   :  { %1590 = vmatmul.mubr.f32.gmra.mrb[14].mxu0 %v40_v39 }
 0x108   :  { %v1570_v0 = vpop.f32.mrb[0].mxu0 }
 0x109   :  { %v123_v1 = vpop.f32.mrb[1].mxu0 }
 0x10a   :  { %v204_v2 = vadd.f32 %v1570_v0, %v123_v1 }
 0x10c   :  { %v1573_v3 = vpop.f32.mrb[2].mxu0 }
 0x10d   :  { %v133_v4 = vpop.f32.mrb[3].mxu0 }
 0x10e   :  { %v205_v5 = vadd.f32 %v204_v2, %v133_v4 }
 0x110   :  { %v1576_v6 = vpop.f32.mrb[4].mxu0  ;;  %v206_v7 = vadd.f32 %v1573_v3, %v205_v5 }
 0x111   :  { %v143_v8 = vpop.f32.mrb[5].mxu0 }
 0x112   :  { %v207_v9 = vadd.f32 %v206_v7, %v143_v8 }
 0x114   :  { %v1579_v10 = vpop.f32.mrb[6].mxu0  ;;  %v208_v11 = vadd.f32 %v1576_v6, %v207_v9 }
 0x115   :  { %v153_v12 = vpop.f32.mrb[7].mxu0 }
 0x116   :  { %v209_v13 = vadd.f32 %v208_v11, %v153_v12 }
 0x118   :  { %v1582_v14 = vpop.f32.mrb[8].mxu0  ;;  %v210_v15 = vadd.f32 %v1579_v10, %v209_v13 }
 0x119   :  { %v163_v16 = vpop.f32.mrb[9].mxu0 }
 0x11a   :  { %v211_v17 = vadd.f32 %v210_v15, %v163_v16 }
 0x11c   :  { %v1585_v18 = vpop.f32.mrb[10].mxu0  ;;  %v212_v19 = vadd.f32 %v1582_v14, %v211_v17 }
 0x11d   :  { %v173_v20 = vpop.f32.mrb[11].mxu0 }
 0x11e   :  { %v213_v21 = vadd.f32 %v212_v19, %v173_v20 }
 0x120   :  { %v1588_v22 = vpop.f32.mrb[12].mxu0  ;;  %v214_v23 = vadd.f32 %v1585_v18, %v213_v21 }
 0x121   :  { %v183_v24 = vpop.f32.mrb[13].mxu0 }
 0x122   :  { %v215_v25 = vadd.f32 %v214_v23, %v183_v24 }
 0x124   :  { %v1591_v26 = vpop.f32.mrb[14].mxu0  ;;  %v216_v27 = vadd.f32 %v1588_v22, %v215_v25 }
 0x125   :  { %v193_v28 = vpop.f32.mrb[15].mxu0 }
 0x126   :  { %v217_v29 = vadd.f32 %v216_v27, %v193_v28 }
 0x128   :  { %v218_v30 = vadd.f32 %v1591_v26, %v217_v29  ;;  %v284_v29 = vlaneseq }
 0x12a   :  { %v219_v31 = vrot.slane %v218_v30, 4 }
 0x12c   :  { %v220_v32 = vadd.f32 %v219_v31, %v218_v30  ;;  %v285_v30 = vshrl.u32 %v284_v29, 7  ;;  %v202_v31 = vld [vmem:[#allocation2 + $0x200] sm:$0x1] }
 0x12e   :  { %v221_v33 = vrot.slane %v220_v32, 2 }
 0x130   :  { %v222_v34 = vadd.f32 %v221_v33, %v220_v32  ;;  %v2126_v32 = vsub.s32 0, %v285_v30 }
 0x132   :  { %v223_v35 = vrot.slane %v222_v34, 1 }
 0x134   :  { %v224_v36 = vadd.f32 %v223_v35, %v222_v34 }
 0x136   :  { %v226_v37 = vmul.f32 0.0078125, %v224_v36  ;;  %v1404_v36 = vld [vmem:[#allocation2 + $0x201] ss:$0 sm:$0xff] }
 0x138   :  { %v2065_v38 = vsub.f32 %v123_v1, %v226_v37  ;;  %v2067_v39 = vsub.f32 %v1570_v0, %v226_v37  ;;  %v2069_v40 = vsub.f32 %v133_v4, %v226_v37  ;;  %v2071_v41 = vsub.f32 %v1573_v3, %v226_v37 }
 0x139   :  { %v2073_v42 = vsub.f32 %v143_v8, %v226_v37  ;;  %v2075_v43 = vsub.f32 %v1576_v6, %v226_v37  ;;  %v2077_v44 = vsub.f32 %v153_v12, %v226_v37  ;;  %v2079_v45 = vsub.f32 %v1579_v10, %v226_v37 }
 0x13a   :  { %v2081_v46 = vsub.f32 %v163_v16, %v226_v37  ;;  %v2083_v47 = vsub.f32 %v1582_v14, %v226_v37  ;;  %v2085_v48 = vsub.f32 %v173_v20, %v226_v37  ;;  %v2087_v49 = vsub.f32 %v1585_v18, %v226_v37 }
 0x13b   :  { %v2089_v50 = vsub.f32 %v183_v24, %v226_v37  ;;  %v2091_v51 = vsub.f32 %v1588_v22, %v226_v37  ;;  %v241_v52 = vsub.f32 %v193_v28, %v226_v37  ;;  %v2093_v53 = vsub.f32 %v1591_v26, %v226_v37 }
 0x13c   :  { %v243_v54 = vmul.f32 %v2065_v38, %v2065_v38  ;;  %v244_v55 = vmul.f32 %v2067_v39, %v2067_v39  ;;  %v245_v56 = vmul.f32 %v2069_v40, %v2069_v40  ;;  %v246_v58 = vmul.f32 %v2071_v41, %v2071_v41 }
 0x13d   :  { %v247_v60 = vmul.f32 %v2073_v42, %v2073_v42  ;;  %v248_v62 = vmul.f32 %v2075_v43, %v2075_v43  ;;  %v249_v0 = vmul.f32 %v2077_v44, %v2077_v44  ;;  %v250_v2 = vmul.f32 %v2079_v45, %v2079_v45 }
 0x13e   :  { %v259_v57 = vadd.f32 %v244_v55, %v243_v54  ;;  %v251_v4 = vmul.f32 %v2081_v46, %v2081_v46  ;;  %v252_v6 = vmul.f32 %v2083_v47, %v2083_v47  ;;  %v253_v8 = vmul.f32 %v2085_v48, %v2085_v48 }
 0x13f   :  { %v254_v10 = vmul.f32 %v2087_v49, %v2087_v49  ;;  %v255_v12 = vmul.f32 %v2089_v50, %v2089_v50  ;;  %v256_v14 = vmul.f32 %v2091_v51, %v2091_v51  ;;  %v257_v16 = vmul.f32 %v241_v52, %v241_v52 }
 0x140   :  { %v260_v59 = vadd.f32 %v259_v57, %v245_v56  ;;  %v258_v18 = vmul.f32 %v2093_v53, %v2093_v53 }
 0x142   :  { %v261_v61 = vadd.f32 %v260_v59, %v246_v58 }
 0x144   :  { %v262_v63 = vadd.f32 %v261_v61, %v247_v60 }
 0x146   :  { %v263_v1 = vadd.f32 %v262_v63, %v248_v62 }
 0x148   :  { %v264_v3 = vadd.f32 %v263_v1, %v249_v0 }
 0x14a   :  { %v265_v5 = vadd.f32 %v264_v3, %v250_v2 }
 0x14c   :  { %v266_v7 = vadd.f32 %v265_v5, %v251_v4 }
 0x14e   :  { %v267_v9 = vadd.f32 %v266_v7, %v252_v6 }
 0x150   :  { %v268_v11 = vadd.f32 %v267_v9, %v253_v8 }
 0x152   :  { %v269_v13 = vadd.f32 %v268_v11, %v254_v10 }
 0x154   :  { %v270_v15 = vadd.f32 %v269_v13, %v255_v12 }
 0x156   :  { %v271_v17 = vadd.f32 %v270_v15, %v256_v14 }
 0x158   :  { %v272_v19 = vadd.f32 %v271_v17, %v257_v16 }
 0x15a   :  { %v273_v20 = vadd.f32 %v272_v19, %v258_v18 }
 0x15c   :  { %v274_v21 = vrot.slane %v273_v20, 4 }
 0x15e   :  { %v275_v22 = vadd.f32 %v274_v21, %v273_v20  ;;  %v622_v21 = vld [vmem:[#allocation2 + $0x100] sm:$0xff] }
 0x160   :  { %v276_v23 = vrot.slane %v275_v22, 2 }
 0x162   :  { %v277_v24 = vadd.f32 %v276_v23, %v275_v22  ;;  %v623_v22 = vld [vmem:[#allocation2 + $0x108] sm:$0xff] }
 0x163   :  { %v1824_v23 = vpack.c.bf16 %v623_v22, %v622_v21 }
 0x164   :  { %v278_v25 = vrot.slane %v277_v24, 1 }
 0x165   :  { %1825 = vmatprep.subr.bf16.mxu0 %v1824_v23 }
 0x166   :  { %v279_v26 = vadd.f32 %v278_v25, %v277_v24  ;;  %1827 = vmatpush3.bf16.msra.mxu0 %v1824_v23  ;;  %v624_v24 = vld [vmem:[#allocation2 + $0x110] sm:$0xff]  ;;  %v625_v25 = vld [vmem:[#allocation2 + $0x118] sm:$0xff] }
 0x168   :  { %v280_v27 = vmul.f32 0.0078125, %v279_v26  ;;  %v1828_v26 = vpack.c.bf16 %v625_v25, %v624_v24 }
 0x16a   :  { %v281_v28 = vadd.f32 1e-05, %v280_v27  ;;  %1829 = vmatprep.subr.bf16.mxu0 %v1828_v26  ;;  %v626_v27 = vld [vmem:[#allocation2 + $0x120] sm:$0xff] }
 0x16b   :  { %1831 = vmatpush3.bf16.msra.mxu0 %v1828_v26 }
 0x16c   :  { %1891 = vrsqrt.f32 %v281_v28  ;;  %v627_v28 = vld [vmem:[#allocation2 + $0x128] sm:$0xff] }
 0x16d   :  { %v1832_v30 = vpack.c.bf16 %v627_v28, %v626_v27 }
 0x16f   :  { %1833 = vmatprep.subr.bf16.mxu0 %v1832_v30 }
 0x170   :  { %1835 = vmatpush3.bf16.msra.mxu0 %v1832_v30 }
 0x176   :  { %v1892_v33 = vpop.eup %1891 }
 0x177   :  { %v283_v34 = vmul.f32 %v1892_v33, %v202_v31  ;;  %v628_v31 = vld [vmem:[#allocation2 + $0x130] sm:$0xff]  ;;  %v629_v33 = vld [vmem:[#allocation2 + $0x138] sm:$0xff] }
 0x179   :  { %v287_v35 = vrot.slane %v283_v34, %v2126_v32  ;;  %v1836_v34 = vpack.c.bf16 %v629_v33, %v628_v31 }
 0x17b   :  { %v302_v37 = vmul.f32 %v287_v35, %v241_v52  ;;  %v288_v54 = vmul.f32 %v287_v35, %v2065_v38  ;;  %v289_v55 = vmul.f32 %v287_v35, %v2067_v39  ;;  %v290_v56 = vmul.f32 %v287_v35, %v2069_v40  ;;  %1837 = vmatprep.subr.bf16.mxu0 %v1836_v34 }
 0x17c   :  { %v291_v57 = vmul.f32 %v287_v35, %v2071_v41  ;;  %v292_v58 = vmul.f32 %v287_v35, %v2073_v42  ;;  %v293_v59 = vmul.f32 %v287_v35, %v2075_v43  ;;  %v294_v60 = vmul.f32 %v287_v35, %v2077_v44  ;;  %1839 = vmatpush3.bf16.msra.mxu0 %v1836_v34 }
 0x17d   :  { %v308_v61 = vadd.f32 %v1404_v36, %v288_v54  ;;  %v309_v62 = vadd.f32 %v1404_v36, %v289_v55  ;;  %v310_v63 = vadd.f32 %v1404_v36, %v290_v56  ;;  %v295_v0 = vmul.f32 %v287_v35, %v2079_v45  ;;  %v632_v54 = vld [vmem:[#allocation2 + $0x150] sm:$0xff]  ;;  %v633_v55 = vld [vmem:[#allocation2 + $0x158] sm:$0xff] }
 0x17e   :  { %v311_v38 = vadd.f32 %v1404_v36, %v291_v57  ;;  %v312_v2 = vadd.f32 %v1404_v36, %v292_v58  ;;  %v296_v40 = vmul.f32 %v287_v35, %v2081_v46  ;;  %v297_v41 = vmul.f32 %v287_v35, %v2083_v47  ;;  %v634_v57 = vld [vmem:[#allocation2 + $0x160] sm:$0xff]  ;;  %v635_v58 = vld [vmem:[#allocation2 + $0x168] sm:$0xff] }
 0x17f   :  { %v324_v52 = vmax.f32 %v308_v61, 0.0  ;;  %v325_v1 = vmax.f32 %v309_v62, 0.0  ;;  %v326_v39 = vmax.f32 %v310_v63, 0.0  ;;  %v298_v42 = vmul.f32 %v287_v35, %v2085_v48  ;;  %v637_v61 = vld [vmem:[#allocation2 + $0x178] sm:$0xff] }
 0x180   :  { %v299_v43 = vmul.f32 %v287_v35, %v2087_v49  ;;  %v300_v44 = vmul.f32 %v287_v35, %v2089_v50  ;;  %v301_v3 = vmul.f32 %v287_v35, %v2091_v51  ;;  %v303_v45 = vmul.f32 %v287_v35, %v2093_v53  ;;  %v630_v35 = vld [vmem:[#allocation2 + $0x140] sm:$0xff] }
 0x181   :  { %1624 = vmatprep.mubr.f32.mxu1 %v324_v52  ;;  %v327_v4 = vmax.f32 %v311_v38, 0.0  ;;  %v313_v5 = vadd.f32 %v1404_v36, %v293_v59  ;;  %v328_v6 = vmax.f32 %v312_v2, 0.0  ;;  %v314_v7 = vadd.f32 %v1404_v36, %v294_v60  ;;  %v636_v60 = vld [vmem:[#allocation2 + $0x170] sm:$0xff] }
 0x182   :  { %1625 = vmatmul.mubr.f32.vlgmr.msra.gmra.mrb[0].mxu1 %v325_v1  ;;  %v315_v47 = vadd.f32 %v1404_v36, %v295_v0  ;;  %v316_v48 = vadd.f32 %v1404_v36, %v296_v40  ;;  %v317_v9 = vadd.f32 %v1404_v36, %v297_v41  ;;  %v318_v10 = vadd.f32 %v1404_v36, %v298_v42 }
 0x183   :  { %1627 = vmatprep.mubr.f32.mxu1 %v326_v39  ;;  %v329_v46 = vmax.f32 %v313_v5, 0.0  ;;  %v330_v8 = vmax.f32 %v314_v7, 0.0  ;;  %v319_v53 = vadd.f32 %v1404_v36, %v299_v43  ;;  %v320_v12 = vadd.f32 %v1404_v36, %v300_v44 }
 0x184   :  { %v331_v49 = vmax.f32 %v315_v47, 0.0  ;;  %v332_v50 = vmax.f32 %v316_v48, 0.0  ;;  %v333_v51 = vmax.f32 %v317_v9, 0.0  ;;  %v334_v11 = vmax.f32 %v318_v10, 0.0 }
 0x185   :  { %v335_v13 = vmax.f32 %v319_v53, 0.0  ;;  %v321_v14 = vadd.f32 %v1404_v36, %v301_v3  ;;  %v336_v15 = vmax.f32 %v320_v12, 0.0  ;;  %v322_v16 = vadd.f32 %v1404_v36, %v302_v37 }
 0x186   :  { %1628 = vmatmul.mubr.f32.gmra.mrb[2].mxu1 %v327_v4  ;;  %v323_v18 = vadd.f32 %v1404_v36, %v303_v45  ;;  %v631_v36 = vld [vmem:[#allocation2 + $0x148] sm:$0xff]  ;;  %v1844_v56 = vpack.c.bf16 %v633_v55, %v632_v54  ;;  %v1848_v59 = vpack.c.bf16 %v635_v58, %v634_v57  ;;  %v1852_v62 = vpack.c.bf16 %v637_v61, %v636_v60 }
 0x187   :  { %1630 = vmatprep.mubr.f32.mxu1 %v328_v6  ;;  %v337_v17 = vmax.f32 %v321_v14, 0.0  ;;  %v338_v19 = vmax.f32 %v322_v16, 0.0  ;;  %v1840_v37 = vpack.c.bf16 %v631_v36, %v630_v35 }
 0x188   :  { %v339_v20 = vmax.f32 %v323_v18, 0.0 }
 0x189   :  { %1841 = vmatprep.subr.bf16.mxu0 %v1840_v37 }
 0x18a   :  { %1631 = vmatmul.mubr.f32.gmra.mrb[4].mxu1 %v329_v46  ;;  %1843 = vmatpush3.bf16.msra.mxu0 %v1840_v37 }
 0x18b   :  { %1633 = vmatprep.mubr.f32.mxu1 %v330_v8  ;;  %1845 = vmatprep.subr.bf16.mxu0 %v1844_v56 }
 0x18e   :  { %1634 = vmatmul.mubr.f32.gmra.mrb[6].mxu1 %v331_v49  ;;  %1847 = vmatpush3.bf16.msra.mxu0 %v1844_v56 }
 0x18f   :  { %1636 = vmatprep.mubr.f32.mxu1 %v332_v50  ;;  %1849 = vmatprep.subr.bf16.mxu0 %v1848_v59 }
 0x192   :  { %1637 = vmatmul.mubr.f32.gmra.mrb[8].mxu1 %v333_v51  ;;  %1851 = vmatpush3.bf16.msra.mxu0 %v1848_v59 }
 0x193   :  { %1639 = vmatprep.mubr.f32.mxu1 %v334_v11  ;;  %1853 = vmatprep.subr.bf16.mxu0 %v1852_v62 }
 0x196   :  { %1640 = vmatmul.mubr.f32.gmra.mrb[10].mxu1 %v335_v13  ;;  %1855 = vmatpush3.bf16.msra.mxu0 %v1852_v62 }
 0x197   :  { %1642 = vmatprep.mubr.f32.mxu1 %v336_v15 }
 0x19a   :  { %1643 = vmatmul.mubr.f32.gmra.mrb[12].mxu1 %v337_v17 }
 0x19b   :  { %1645 = vmatprep.mubr.f32.mxu1 %v338_v19 }
 0x19e   :  { %1646 = vmatmul.mubr.f32.gmra.mrb[14].mxu1 %v339_v20 }
 0x255   :  { %v1626_v63 = vpop.f32.mrb[0].mxu1 }
 0x256   :  { %v422_v0 = vpop.f32.mrb[1].mxu1 }
 0x257   :  { %v503_v52 = vadd.f32 %v1626_v63, %v422_v0 }
 0x259   :  { %v1629_v1 = vpop.f32.mrb[2].mxu1 }
 0x25a   :  { %v432_v38 = vpop.f32.mrb[3].mxu1 }
 0x25b   :  { %v504_v2 = vadd.f32 %v503_v52, %v432_v38 }
 0x25d   :  { %v1632_v39 = vpop.f32.mrb[4].mxu1  ;;  %v505_v40 = vadd.f32 %v1629_v1, %v504_v2 }
 0x25e   :  { %v442_v41 = vpop.f32.mrb[5].mxu1 }
 0x25f   :  { %v506_v42 = vadd.f32 %v505_v40, %v442_v41 }
 0x261   :  { %v1635_v43 = vpop.f32.mrb[6].mxu1  ;;  %v507_v44 = vadd.f32 %v1632_v39, %v506_v42 }
 0x262   :  { %v452_v3 = vpop.f32.mrb[7].mxu1 }
 0x263   :  { %v508_v45 = vadd.f32 %v507_v44, %v452_v3 }
 0x265   :  { %v1638_v4 = vpop.f32.mrb[8].mxu1  ;;  %v509_v5 = vadd.f32 %v1635_v43, %v508_v45 }
 0x266   :  { %v462_v6 = vpop.f32.mrb[9].mxu1 }
 0x267   :  { %v510_v7 = vadd.f32 %v509_v5, %v462_v6 }
 0x269   :  { %v1641_v46 = vpop.f32.mrb[10].mxu1  ;;  %v511_v47 = vadd.f32 %v1638_v4, %v510_v7 }
 0x26a   :  { %v472_v8 = vpop.f32.mrb[11].mxu1 }
 0x26b   :  { %v512_v48 = vadd.f32 %v511_v47, %v472_v8 }
 0x26d   :  { %v1644_v49 = vpop.f32.mrb[12].mxu1  ;;  %v513_v9 = vadd.f32 %v1641_v46, %v512_v48 }
 0x26e   :  { %v482_v50 = vpop.f32.mrb[13].mxu1 }
 0x26f   :  { %v514_v10 = vadd.f32 %v513_v9, %v482_v50 }
 0x271   :  { %v1647_v51 = vpop.f32.mrb[14].mxu1  ;;  %v515_v53 = vadd.f32 %v1644_v49, %v514_v10 }
 0x272   :  { %v492_v11 = vpop.f32.mrb[15].mxu1 }
 0x273   :  { %v516_v12 = vadd.f32 %v515_v53, %v492_v11 }
 0x275   :  { %v517_v13 = vadd.f32 %v1647_v51, %v516_v12 }
 0x277   :  { %v518_v14 = vrot.slane %v517_v13, 4 }
 0x279   :  { %v519_v15 = vadd.f32 %v518_v14, %v517_v13  ;;  %v501_v14 = vld [vmem:[#allocation2 + $0x202] sm:$0x1] }
 0x27b   :  { %v520_v16 = vrot.slane %v519_v15, 2 }
 0x27d   :  { %v521_v17 = vadd.f32 %v520_v16, %v519_v15 }
 0x27f   :  { %v522_v18 = vrot.slane %v521_v17, 1 }
 0x281   :  { %v523_v19 = vadd.f32 %v522_v18, %v521_v17  ;;  %v1405_v18 = vld [vmem:[#allocation2 + $0x203] ss:$0 sm:$0xff] }
 0x283   :  { %v524_v20 = vmul.f32 0.0078125, %v523_v19 }
 0x285   :  { %v525_v21 = vsub.f32 %v422_v0, %v524_v20  ;;  %v526_v22 = vsub.f32 %v1626_v63, %v524_v20  ;;  %v527_v23 = vsub.f32 %v432_v38, %v524_v20  ;;  %v528_v24 = vsub.f32 %v1629_v1, %v524_v20 }
 0x286   :  { %v529_v25 = vsub.f32 %v442_v41, %v524_v20  ;;  %v530_v26 = vsub.f32 %v1632_v39, %v524_v20  ;;  %v531_v27 = vsub.f32 %v452_v3, %v524_v20  ;;  %v2144_v28 = vsub.f32 %v1635_v43, %v524_v20 }
 0x287   :  { %v2146_v30 = vsub.f32 %v462_v6, %v524_v20  ;;  %v2148_v31 = vsub.f32 %v1638_v4, %v524_v20  ;;  %v2150_v33 = vsub.f32 %v472_v8, %v524_v20  ;;  %v2152_v34 = vsub.f32 %v1641_v46, %v524_v20 }
 0x288   :  { %v2154_v35 = vsub.f32 %v482_v50, %v524_v20  ;;  %v2156_v36 = vsub.f32 %v1644_v49, %v524_v20  ;;  %v539_v37 = vsub.f32 %v492_v11, %v524_v20  ;;  %v2158_v54 = vsub.f32 %v1647_v51, %v524_v20 }
 0x289   :  { %v541_v55 = vmul.f32 %v525_v21, %v525_v21  ;;  %v542_v56 = vmul.f32 %v526_v22, %v526_v22  ;;  %v543_v57 = vmul.f32 %v527_v23, %v527_v23  ;;  %v544_v59 = vmul.f32 %v528_v24, %v528_v24 }
 0x28a   :  { %v545_v61 = vmul.f32 %v529_v25, %v529_v25  ;;  %v546_v63 = vmul.f32 %v530_v26, %v530_v26  ;;  %v547_v52 = vmul.f32 %v531_v27, %v531_v27  ;;  %v548_v38 = vmul.f32 %v2144_v28, %v2144_v28 }
 0x28b   :  { %v557_v58 = vadd.f32 %v542_v56, %v541_v55  ;;  %v549_v39 = vmul.f32 %v2146_v30, %v2146_v30  ;;  %v550_v41 = vmul.f32 %v2148_v31, %v2148_v31  ;;  %v551_v43 = vmul.f32 %v2150_v33, %v2150_v33 }
 0x28c   :  { %v552_v3 = vmul.f32 %v2152_v34, %v2152_v34  ;;  %v553_v4 = vmul.f32 %v2154_v35, %v2154_v35  ;;  %v554_v6 = vmul.f32 %v2156_v36, %v2156_v36  ;;  %v555_v46 = vmul.f32 %v539_v37, %v539_v37 }
 0x28d   :  { %v558_v60 = vadd.f32 %v557_v58, %v543_v57  ;;  %v556_v8 = vmul.f32 %v2158_v54, %v2158_v54 }
 0x28f   :  { %v559_v62 = vadd.f32 %v558_v60, %v544_v59 }
 0x291   :  { %v560_v0 = vadd.f32 %v559_v62, %v545_v61 }
 0x293   :  { %v561_v1 = vadd.f32 %v560_v0, %v546_v63 }
 0x295   :  { %v562_v2 = vadd.f32 %v561_v1, %v547_v52 }
 0x297   :  { %v563_v40 = vadd.f32 %v562_v2, %v548_v38 }
 0x299   :  { %v564_v42 = vadd.f32 %v563_v40, %v549_v39  ;;  %v904_v39 = vld [vmem:[#allocation2 + $0x180] sm:$0xff]  ;;  %v905_v40 = vld [vmem:[#allocation2 + $0x188] sm:$0xff] }
 0x29b   :  { %v565_v44 = vadd.f32 %v564_v42, %v550_v41  ;;  %v1856_v41 = vpack.c.bf16 %v905_v40, %v904_v39  ;;  %v906_v42 = vld [vmem:[#allocation2 + $0x190] sm:$0xff] }
 0x29d   :  { %v566_v45 = vadd.f32 %v565_v44, %v551_v43  ;;  %1857 = vmatprep.subr.bf16.mxu1 %v1856_v41  ;;  %v907_v43 = vld [vmem:[#allocation2 + $0x198] sm:$0xff] }
 0x29e   :  { %1859 = vmatpush3.bf16.msra.mxu1 %v1856_v41  ;;  %v1860_v44 = vpack.c.bf16 %v907_v43, %v906_v42 }
 0x29f   :  { %v567_v5 = vadd.f32 %v566_v45, %v552_v3  ;;  %v908_v3 = vld [vmem:[#allocation2 + $0x1a0] sm:$0xff]  ;;  %v909_v45 = vld [vmem:[#allocation2 + $0x1a8] sm:$0xff] }
 0x2a0   :  { %1861 = vmatprep.subr.bf16.mxu1 %v1860_v44 }
 0x2a1   :  { %v568_v7 = vadd.f32 %v567_v5, %v553_v4  ;;  %v1864_v4 = vpack.c.bf16 %v909_v45, %v908_v3  ;;  %v910_v5 = vld [vmem:[#allocation2 + $0x1b0] sm:$0xff] }
 0x2a2   :  { %1863 = vmatpush3.bf16.msra.mxu1 %v1860_v44 }
 0x2a3   :  { %v569_v47 = vadd.f32 %v568_v7, %v554_v6  ;;  %1865 = vmatprep.subr.bf16.mxu1 %v1864_v4  ;;  %v911_v6 = vld [vmem:[#allocation2 + $0x1b8] sm:$0xff] }
 0x2a4   :  { %v1868_v7 = vpack.c.bf16 %v911_v6, %v910_v5 }
 0x2a5   :  { %v570_v48 = vadd.f32 %v569_v47, %v555_v46  ;;  %v912_v46 = vld [vmem:[#allocation2 + $0x1c0] sm:$0xff]  ;;  %v913_v47 = vld [vmem:[#allocation2 + $0x1c8] sm:$0xff] }
 0x2a6   :  { %1867 = vmatpush3.bf16.msra.mxu1 %v1864_v4 }
 0x2a7   :  { %v571_v49 = vadd.f32 %v570_v48, %v556_v8  ;;  %1869 = vmatprep.subr.bf16.mxu1 %v1868_v7  ;;  %v1872_v8 = vpack.c.bf16 %v913_v47, %v912_v46  ;;  %v914_v48 = vld [vmem:[#allocation2 + $0x1d0] sm:$0xff] }
 0x2a9   :  { %v572_v9 = vrot.slane %v571_v49, 4 }
 0x2aa   :  { %1871 = vmatpush3.bf16.msra.mxu1 %v1868_v7 }
 0x2ab   :  { %v573_v50 = vadd.f32 %v572_v9, %v571_v49  ;;  %1873 = vmatprep.subr.bf16.mxu1 %v1872_v8  ;;  %v915_v49 = vld [vmem:[#allocation2 + $0x1d8] sm:$0xff] }
 0x2ac   :  { %v1876_v9 = vpack.c.bf16 %v915_v49, %v914_v48 }
 0x2ad   :  { %v574_v10 = vrot.slane %v573_v50, 2 }
 0x2ae   :  { %1875 = vmatpush3.bf16.msra.mxu1 %v1872_v8 }
 0x2af   :  { %v575_v51 = vadd.f32 %v574_v10, %v573_v50  ;;  %1877 = vmatprep.subr.bf16.mxu1 %v1876_v9  ;;  %v916_v50 = vld [vmem:[#allocation2 + $0x1e0] sm:$0xff]  ;;  %v917_v10 = vld [vmem:[#allocation2 + $0x1e8] sm:$0xff] }
 0x2b1   :  { %v576_v53 = vrot.slane %v575_v51, 1 }
 0x2b2   :  { %1879 = vmatpush3.bf16.msra.mxu1 %v1876_v9 }
 0x2b3   :  { %v577_v11 = vadd.f32 %v576_v53, %v575_v51  ;;  %v1880_v51 = vpack.c.bf16 %v917_v10, %v916_v50  ;;  %v918_v53 = vld [vmem:[#allocation2 + $0x1f0] sm:$0xff] }
 0x2b5   :  { %v578_v12 = vmul.f32 0.0078125, %v577_v11  ;;  %1881 = vmatprep.subr.bf16.mxu1 %v1880_v51  ;;  %v919_v11 = vld [vmem:[#allocation2 + $0x1f8] sm:$0xff] }
 0x2b6   :  { %1883 = vmatpush3.bf16.msra.mxu1 %v1880_v51 }
 0x2b7   :  { %v579_v13 = vadd.f32 1e-05, %v578_v12  ;;  %v1884_v12 = vpack.c.bf16 %v919_v11, %v918_v53 }
 0x2b9   :  { %1893 = vrsqrt.f32 %v579_v13  ;;  %1885 = vmatprep.subr.bf16.mxu1 %v1884_v12 }
 0x2ba   :  { %1887 = vmatpush3.bf16.msra.mxu1 %v1884_v12 }
 0x2c3   :  { %v1894_v15 = vpop.eup %1893 }
 0x2c4   :  { %v581_v16 = vmul.f32 %v1894_v15, %v501_v14 }
 0x2c6   :  { %v585_v17 = vrot.slane %v581_v16, %v2126_v32 }
 0x2c8   :  { %v600_v19 = vmul.f32 %v585_v17, %v539_v37  ;;  %v586_v20 = vmul.f32 %v585_v17, %v525_v21  ;;  %v587_v55 = vmul.f32 %v585_v17, %v526_v22  ;;  %v588_v56 = vmul.f32 %v585_v17, %v527_v23 }
 0x2c9   :  { %v589_v57 = vmul.f32 %v585_v17, %v528_v24  ;;  %v590_v58 = vmul.f32 %v585_v17, %v529_v25  ;;  %v591_v59 = vmul.f32 %v585_v17, %v530_v26  ;;  %v592_v60 = vmul.f32 %v585_v17, %v531_v27 }
 0x2ca   :  { %v606_v61 = vadd.f32 %v1405_v18, %v586_v20  ;;  %v607_v62 = vadd.f32 %v1405_v18, %v587_v55  ;;  %v593_v63 = vmul.f32 %v585_v17, %v2144_v28  ;;  %v608_v0 = vadd.f32 %v1405_v18, %v588_v56 }
 0x2cb   :  { %v594_v52 = vmul.f32 %v585_v17, %v2146_v30  ;;  %v595_v1 = vmul.f32 %v585_v17, %v2148_v31  ;;  %v596_v38 = vmul.f32 %v585_v17, %v2150_v33  ;;  %v597_v21 = vmul.f32 %v585_v17, %v2152_v34 }
 0x2cc   :  { %1680 = vmatprep.mubr.f32.mxu0 %v606_v61  ;;  %v598_v22 = vmul.f32 %v585_v17, %v2154_v35  ;;  %v599_v23 = vmul.f32 %v585_v17, %v2156_v36  ;;  %v601_v24 = vmul.f32 %v585_v17, %v2158_v54  ;;  %v609_v25 = vadd.f32 %v1405_v18, %v589_v57 }
 0x2cd   :  { %1681 = vmatmul.mubr.f32.vlgmr.msra.gmra.mrb[16].mxu0 %v607_v62  ;;  %v610_v26 = vadd.f32 %v1405_v18, %v590_v58  ;;  %v611_v27 = vadd.f32 %v1405_v18, %v591_v59  ;;  %v612_v28 = vadd.f32 %v1405_v18, %v592_v60  ;;  %v613_v30 = vadd.f32 %v1405_v18, %v593_v63 }
 0x2ce   :  { %1683 = vmatprep.mubr.f32.mxu0 %v608_v0  ;;  %v614_v31 = vadd.f32 %v1405_v18, %v594_v52  ;;  %v615_v33 = vadd.f32 %v1405_v18, %v595_v1  ;;  %v616_v34 = vadd.f32 %v1405_v18, %v596_v38  ;;  %v617_v35 = vadd.f32 %v1405_v18, %v597_v21 }
 0x2cf   :  { %v618_v36 = vadd.f32 %v1405_v18, %v598_v22  ;;  %v619_v37 = vadd.f32 %v1405_v18, %v599_v23  ;;  %v620_v54 = vadd.f32 %v1405_v18, %v600_v19  ;;  %v621_v2 = vadd.f32 %v1405_v18, %v601_v24 }
 0x2d1   :  { %1684 = vmatmul.mubr.f32.gmra.mrb[18].mxu0 %v609_v25 }
 0x2d2   :  { %1686 = vmatprep.mubr.f32.mxu0 %v610_v26 }
 0x2d5   :  { %1687 = vmatmul.mubr.f32.gmra.mrb[20].mxu0 %v611_v27 }
 0x2d6   :  { %1689 = vmatprep.mubr.f32.mxu0 %v612_v28 }
 0x2d9   :  { %1690 = vmatmul.mubr.f32.gmra.mrb[22].mxu0 %v613_v30 }
 0x2da   :  { %1692 = vmatprep.mubr.f32.mxu0 %v614_v31 }
 0x2dd   :  { %1693 = vmatmul.mubr.f32.gmra.mrb[24].mxu0 %v615_v33 }
 0x2de   :  { %1695 = vmatprep.mubr.f32.mxu0 %v616_v34 }
 0x2e1   :  { %1696 = vmatmul.mubr.f32.gmra.mrb[26].mxu0 %v617_v35 }
 0x2e2   :  { %1698 = vmatprep.mubr.f32.mxu0 %v618_v36 }
 0x2e5   :  { %1699 = vmatmul.mubr.f32.gmra.mrb[28].mxu0 %v619_v37 }
 0x2e6   :  { %1701 = vmatprep.mubr.f32.mxu0 %v620_v54 }
 0x2e9   :  { %1702 = vmatmul.mubr.f32.gmra.mrb[30].mxu0 %v621_v2 }
 0x3a0   :  { %v1682_v13 = vpop.f32.mrb[16].mxu0 }
 0x3a1   :  { %v704_v14 = vpop.f32.mrb[17].mxu0 }
 0x3a2   :  { %v785_v15 = vadd.f32 %v1682_v13, %v704_v14 }
 0x3a4   :  { %v1685_v16 = vpop.f32.mrb[18].mxu0 }
 0x3a5   :  { %v714_v17 = vpop.f32.mrb[19].mxu0 }
 0x3a6   :  { %v786_v18 = vadd.f32 %v785_v15, %v714_v17 }
 0x3a8   :  { %v1688_v19 = vpop.f32.mrb[20].mxu0  ;;  %v787_v20 = vadd.f32 %v1685_v16, %v786_v18 }
 0x3a9   :  { %v724_v55 = vpop.f32.mrb[21].mxu0 }
 0x3aa   :  { %v788_v56 = vadd.f32 %v787_v20, %v724_v55 }
 0x3ac   :  { %v1691_v57 = vpop.f32.mrb[22].mxu0  ;;  %v789_v58 = vadd.f32 %v1688_v19, %v788_v56 }
 0x3ad   :  { %v734_v59 = vpop.f32.mrb[23].mxu0 }
 0x3ae   :  { %v790_v60 = vadd.f32 %v789_v58, %v734_v59 }
 0x3b0   :  { %v1694_v61 = vpop.f32.mrb[24].mxu0  ;;  %v791_v62 = vadd.f32 %v1691_v57, %v790_v60 }
 0x3b1   :  { %v744_v63 = vpop.f32.mrb[25].mxu0 }
 0x3b2   :  { %v792_v0 = vadd.f32 %v791_v62, %v744_v63 }
 0x3b4   :  { %v1697_v52 = vpop.f32.mrb[26].mxu0  ;;  %v793_v1 = vadd.f32 %v1694_v61, %v792_v0 }
 0x3b5   :  { %v754_v38 = vpop.f32.mrb[27].mxu0 }
 0x3b6   :  { %v794_v21 = vadd.f32 %v793_v1, %v754_v38 }
 0x3b8   :  { %v1700_v22 = vpop.f32.mrb[28].mxu0  ;;  %v795_v23 = vadd.f32 %v1697_v52, %v794_v21 }
 0x3b9   :  { %v764_v24 = vpop.f32.mrb[29].mxu0 }
 0x3ba   :  { %v796_v25 = vadd.f32 %v795_v23, %v764_v24 }
 0x3bc   :  { %v1703_v26 = vpop.f32.mrb[30].mxu0  ;;  %v797_v27 = vadd.f32 %v1700_v22, %v796_v25 }
 0x3bd   :  { %v774_v28 = vpop.f32.mrb[31].mxu0 }
 0x3be   :  { %v798_v30 = vadd.f32 %v797_v27, %v774_v28 }
 0x3c0   :  { %v799_v31 = vadd.f32 %v1703_v26, %v798_v30 }
 0x3c2   :  { %v800_v33 = vrot.slane %v799_v31, 4 }
 0x3c4   :  { %v801_v34 = vadd.f32 %v800_v33, %v799_v31  ;;  %v783_v33 = vld [vmem:[#allocation2 + $0x204] sm:$0x1] }
 0x3c6   :  { %v802_v35 = vrot.slane %v801_v34, 2 }
 0x3c8   :  { %v803_v36 = vadd.f32 %v802_v35, %v801_v34 }
 0x3ca   :  { %v804_v37 = vrot.slane %v803_v36, 1 }
 0x3cc   :  { %v805_v54 = vadd.f32 %v804_v37, %v803_v36  ;;  %v1406_v37 = vld [vmem:[#allocation2 + $0x205] ss:$0 sm:$0xff] }
 0x3ce   :  { %v806_v2 = vmul.f32 0.0078125, %v805_v54 }
 0x3d0   :  { %v807_v39 = vsub.f32 %v704_v14, %v806_v2  ;;  %v808_v40 = vsub.f32 %v1682_v13, %v806_v2  ;;  %v809_v41 = vsub.f32 %v714_v17, %v806_v2  ;;  %v810_v42 = vsub.f32 %v1685_v16, %v806_v2 }
 0x3d1   :  { %v811_v43 = vsub.f32 %v724_v55, %v806_v2  ;;  %v812_v44 = vsub.f32 %v1688_v19, %v806_v2  ;;  %v813_v3 = vsub.f32 %v734_v59, %v806_v2  ;;  %v2185_v45 = vsub.f32 %v1691_v57, %v806_v2 }
 0x3d2   :  { %v2187_v4 = vsub.f32 %v744_v63, %v806_v2  ;;  %v2189_v5 = vsub.f32 %v1694_v61, %v806_v2  ;;  %v2191_v6 = vsub.f32 %v754_v38, %v806_v2  ;;  %v2193_v7 = vsub.f32 %v1697_v52, %v806_v2 }
 0x3d3   :  { %v2195_v46 = vsub.f32 %v764_v24, %v806_v2  ;;  %v2197_v47 = vsub.f32 %v1700_v22, %v806_v2  ;;  %v821_v8 = vsub.f32 %v774_v28, %v806_v2  ;;  %v2199_v48 = vsub.f32 %v1703_v26, %v806_v2 }
 0x3d4   :  { %v823_v49 = vmul.f32 %v807_v39, %v807_v39  ;;  %v824_v9 = vmul.f32 %v808_v40, %v808_v40  ;;  %v825_v50 = vmul.f32 %v809_v41, %v809_v41  ;;  %v826_v51 = vmul.f32 %v810_v42, %v810_v42 }
 0x3d5   :  { %v827_v11 = vmul.f32 %v811_v43, %v811_v43  ;;  %v828_v13 = vmul.f32 %v812_v44, %v812_v44  ;;  %v829_v15 = vmul.f32 %v813_v3, %v813_v3  ;;  %v830_v17 = vmul.f32 %v2185_v45, %v2185_v45 }
 0x3d6   :  { %v839_v10 = vadd.f32 %v824_v9, %v823_v49  ;;  %v831_v19 = vmul.f32 %v2187_v4, %v2187_v4  ;;  %v832_v55 = vmul.f32 %v2189_v5, %v2189_v5  ;;  %v833_v57 = vmul.f32 %v2191_v6, %v2191_v6 }
 0x3d7   :  { %v834_v59 = vmul.f32 %v2193_v7, %v2193_v7  ;;  %v835_v61 = vmul.f32 %v2195_v46, %v2195_v46  ;;  %v836_v63 = vmul.f32 %v2197_v47, %v2197_v47  ;;  %v837_v52 = vmul.f32 %v821_v8, %v821_v8 }
 0x3d8   :  { %v840_v53 = vadd.f32 %v839_v10, %v825_v50  ;;  %v838_v38 = vmul.f32 %v2199_v48, %v2199_v48 }
 0x3da   :  { %v841_v12 = vadd.f32 %v840_v53, %v826_v51 }
 0x3dc   :  { %v842_v14 = vadd.f32 %v841_v12, %v827_v11 }
 0x3de   :  { %v843_v16 = vadd.f32 %v842_v14, %v828_v13 }
 0x3e0   :  { %v844_v18 = vadd.f32 %v843_v16, %v829_v15 }
 0x3e2   :  { %v845_v20 = vadd.f32 %v844_v18, %v830_v17 }
 0x3e4   :  { %v846_v56 = vadd.f32 %v845_v20, %v831_v19 }
 0x3e6   :  { %v847_v58 = vadd.f32 %v846_v56, %v832_v55 }
 0x3e8   :  { %v848_v60 = vadd.f32 %v847_v58, %v833_v57 }
 0x3ea   :  { %v849_v62 = vadd.f32 %v848_v60, %v834_v59 }
 0x3ec   :  { %v850_v0 = vadd.f32 %v849_v62, %v835_v61 }
 0x3ee   :  { %v851_v1 = vadd.f32 %v850_v0, %v836_v63 }
 0x3f0   :  { %v852_v21 = vadd.f32 %v851_v1, %v837_v52 }
 0x3f2   :  { %v853_v22 = vadd.f32 %v852_v21, %v838_v38 }
 0x3f4   :  { %v854_v23 = vrot.slane %v853_v22, 4 }
 0x3f6   :  { %v855_v24 = vadd.f32 %v854_v23, %v853_v22 }
 0x3f8   :  { %v856_v25 = vrot.slane %v855_v24, 2 }
 0x3fa   :  { %v857_v26 = vadd.f32 %v856_v25, %v855_v24 }
 0x3fc   :  { %v858_v27 = vrot.slane %v857_v26, 1 }
 0x3fe   :  { %v859_v28 = vadd.f32 %v858_v27, %v857_v26 }
 0x400   :  { %v860_v30 = vmul.f32 0.0078125, %v859_v28 }
 0x402   :  { %v861_v31 = vadd.f32 1e-05, %v860_v30 }
 0x404   :  { %1895 = vrsqrt.f32 %v861_v31 }
 0x40e   :  { %v1896_v34 = vpop.eup %1895 }
 0x40f   :  { %v863_v35 = vmul.f32 %v1896_v34, %v783_v33 }
 0x411   :  { %v867_v36 = vrot.slane %v863_v35, %v2126_v32 }
 0x413   :  { %v882_v54 = vmul.f32 %v867_v36, %v821_v8  ;;  %v868_v2 = vmul.f32 %v867_v36, %v807_v39  ;;  %v869_v49 = vmul.f32 %v867_v36, %v808_v40  ;;  %v870_v9 = vmul.f32 %v867_v36, %v809_v41 }
 0x414   :  { %v871_v50 = vmul.f32 %v867_v36, %v810_v42  ;;  %v872_v10 = vmul.f32 %v867_v36, %v811_v43  ;;  %v873_v51 = vmul.f32 %v867_v36, %v812_v44  ;;  %v874_v53 = vmul.f32 %v867_v36, %v813_v3 }
 0x415   :  { %v888_v11 = vadd.f32 %v1406_v37, %v868_v2  ;;  %v889_v12 = vadd.f32 %v1406_v37, %v869_v49  ;;  %v875_v13 = vmul.f32 %v867_v36, %v2185_v45  ;;  %v890_v14 = vadd.f32 %v1406_v37, %v870_v9 }
 0x416   :  { %v876_v15 = vmul.f32 %v867_v36, %v2187_v4  ;;  %v877_v16 = vmul.f32 %v867_v36, %v2189_v5  ;;  %v878_v17 = vmul.f32 %v867_v36, %v2191_v6  ;;  %v879_v39 = vmul.f32 %v867_v36, %v2193_v7 }
 0x417   :  { %1736 = vmatprep.mubr.f32.mxu1 %v888_v11  ;;  %v880_v40 = vmul.f32 %v867_v36, %v2195_v46  ;;  %v881_v41 = vmul.f32 %v867_v36, %v2197_v47  ;;  %v883_v42 = vmul.f32 %v867_v36, %v2199_v48  ;;  %v891_v43 = vadd.f32 %v1406_v37, %v871_v50 }
 0x418   :  { %1737 = vmatmul.mubr.f32.vlgmr.msra.gmra.mrb[16].mxu1 %v889_v12  ;;  %v892_v44 = vadd.f32 %v1406_v37, %v872_v10  ;;  %v893_v3 = vadd.f32 %v1406_v37, %v873_v51  ;;  %v894_v45 = vadd.f32 %v1406_v37, %v874_v53  ;;  %v895_v4 = vadd.f32 %v1406_v37, %v875_v13 }
 0x419   :  { %1739 = vmatprep.mubr.f32.mxu1 %v890_v14  ;;  %v896_v5 = vadd.f32 %v1406_v37, %v876_v15  ;;  %v897_v6 = vadd.f32 %v1406_v37, %v877_v16  ;;  %v898_v7 = vadd.f32 %v1406_v37, %v878_v17  ;;  %v899_v46 = vadd.f32 %v1406_v37, %v879_v39 }
 0x41a   :  { %v900_v47 = vadd.f32 %v1406_v37, %v880_v40  ;;  %v901_v8 = vadd.f32 %v1406_v37, %v881_v41  ;;  %v902_v48 = vadd.f32 %v1406_v37, %v882_v54  ;;  %v903_v18 = vadd.f32 %v1406_v37, %v883_v42 }
 0x41c   :  { %1740 = vmatmul.mubr.f32.gmra.mrb[18].mxu1 %v891_v43 }
 0x41d   :  { %1742 = vmatprep.mubr.f32.mxu1 %v892_v44 }
 0x420   :  { %1743 = vmatmul.mubr.f32.gmra.mrb[20].mxu1 %v893_v3 }
 0x421   :  { %1745 = vmatprep.mubr.f32.mxu1 %v894_v45 }
 0x424   :  { %1746 = vmatmul.mubr.f32.gmra.mrb[22].mxu1 %v895_v4 }
 0x425   :  { %1748 = vmatprep.mubr.f32.mxu1 %v896_v5 }
 0x428   :  { %1749 = vmatmul.mubr.f32.gmra.mrb[24].mxu1 %v897_v6 }
 0x429   :  { %1751 = vmatprep.mubr.f32.mxu1 %v898_v7 }
 0x42c   :  { %1752 = vmatmul.mubr.f32.gmra.mrb[26].mxu1 %v899_v46 }
 0x42d   :  { %1754 = vmatprep.mubr.f32.mxu1 %v900_v47 }
 0x430   :  { %1755 = vmatmul.mubr.f32.gmra.mrb[28].mxu1 %v901_v8 }
 0x431   :  { %1757 = vmatprep.mubr.f32.mxu1 %v902_v48 }
 0x434   :  { %1758 = vmatmul.mubr.f32.gmra.mrb[30].mxu1 %v903_v18 }
 0x4eb   :  { %v1738_v19 = vpop.f32.mrb[16].mxu1 }
 0x4ec   :  { %v986_v20 = vpop.f32.mrb[17].mxu1 }
 0x4ed   :  { %v1067_v55 = vadd.f32 %v1738_v19, %v986_v20 }
 0x4ef   :  { %v1741_v56 = vpop.f32.mrb[18].mxu1 }
 0x4f0   :  { %v996_v57 = vpop.f32.mrb[19].mxu1 }
 0x4f1   :  { %v1068_v58 = vadd.f32 %v1067_v55, %v996_v57 }
 0x4f3   :  { %v1744_v59 = vpop.f32.mrb[20].mxu1  ;;  %v1069_v60 = vadd.f32 %v1741_v56, %v1068_v58 }
 0x4f4   :  { %v1006_v61 = vpop.f32.mrb[21].mxu1 }
 0x4f5   :  { %v1070_v62 = vadd.f32 %v1069_v60, %v1006_v61 }
 0x4f7   :  { %v1747_v63 = vpop.f32.mrb[22].mxu1  ;;  %v1071_v0 = vadd.f32 %v1744_v59, %v1070_v62 }
 0x4f8   :  { %v1016_v52 = vpop.f32.mrb[23].mxu1 }
 0x4f9   :  { %v1072_v1 = vadd.f32 %v1071_v0, %v1016_v52 }
 0x4fb   :  { %v1750_v38 = vpop.f32.mrb[24].mxu1  ;;  %v1073_v21 = vadd.f32 %v1747_v63, %v1072_v1 }
 0x4fc   :  { %v1026_v22 = vpop.f32.mrb[25].mxu1 }
 0x4fd   :  { %v1074_v23 = vadd.f32 %v1073_v21, %v1026_v22 }
 0x4ff   :  { %v1753_v24 = vpop.f32.mrb[26].mxu1  ;;  %v1075_v25 = vadd.f32 %v1750_v38, %v1074_v23 }
 0x500   :  { %v1036_v26 = vpop.f32.mrb[27].mxu1 }
 0x501   :  { %v1076_v27 = vadd.f32 %v1075_v25, %v1036_v26 }
 0x503   :  { %v1756_v28 = vpop.f32.mrb[28].mxu1  ;;  %v1077_v30 = vadd.f32 %v1753_v24, %v1076_v27 }
 0x504   :  { %v1046_v31 = vpop.f32.mrb[29].mxu1 }
 0x505   :  { %v1078_v33 = vadd.f32 %v1077_v30, %v1046_v31 }
 0x507   :  { %v1759_v34 = vpop.f32.mrb[30].mxu1  ;;  %v1079_v35 = vadd.f32 %v1756_v28, %v1078_v33 }
 0x508   :  { %v1056_v36 = vpop.f32.mrb[31].mxu1 }
 0x509   :  { %v1080_v37 = vadd.f32 %v1079_v35, %v1056_v36 }
 0x50b   :  { %v1081_v54 = vadd.f32 %v1759_v34, %v1080_v37 }
 0x50d   :  { %v1082_v2 = vrot.slane %v1081_v54, 4 }
 0x50f   :  { %v1083_v49 = vadd.f32 %v1082_v2, %v1081_v54  ;;  %v1065_v2 = vld [vmem:[#allocation2 + $0x206] sm:$0x1] }
 0x511   :  { %v1084_v9 = vrot.slane %v1083_v49, 2 }
 0x513   :  { %v1085_v50 = vadd.f32 %v1084_v9, %v1083_v49 }
 0x515   :  { %v1086_v10 = vrot.slane %v1085_v50, 1 }
 0x517   :  { %v1087_v51 = vadd.f32 %v1086_v10, %v1085_v50  ;;  %v2275_v50 = vand.u32 127, %v284_v29 }
 0x519   :  { %v1088_v53 = vmul.f32 0.0078125, %v1087_v51  ;;  %v1407_v51 = vld [vmem:[#allocation2 + $0x207] ss:$0 sm:$0xff]  ;;  %vm1188_vm0 = vcmp.lt.s32.totalorder %v2275_v50, 5 }
 0x51b   :  { %v2226_v11 = vsub.f32 %v986_v20, %v1088_v53  ;;  %v2228_v12 = vsub.f32 %v1738_v19, %v1088_v53  ;;  %v1091_v13 = vsub.f32 %v996_v57, %v1088_v53  ;;  %v1092_v14 = vsub.f32 %v1741_v56, %v1088_v53 }
 0x51c   :  { %v2230_v15 = vsub.f32 %v1006_v61, %v1088_v53  ;;  %v2232_v16 = vsub.f32 %v1744_v59, %v1088_v53  ;;  %v2234_v17 = vsub.f32 %v1016_v52, %v1088_v53  ;;  %v1096_v39 = vsub.f32 %v1747_v63, %v1088_v53 }
 0x51d   :  { %v2236_v40 = vsub.f32 %v1026_v22, %v1088_v53  ;;  %v2238_v41 = vsub.f32 %v1750_v38, %v1088_v53  ;;  %v2240_v42 = vsub.f32 %v1036_v26, %v1088_v53  ;;  %v2242_v43 = vsub.f32 %v1753_v24, %v1088_v53 }
 0x51e   :  { %v2244_v44 = vsub.f32 %v1046_v31, %v1088_v53  ;;  %v2246_v3 = vsub.f32 %v1756_v28, %v1088_v53  ;;  %v1103_v45 = vsub.f32 %v1056_v36, %v1088_v53  ;;  %v2248_v4 = vsub.f32 %v1759_v34, %v1088_v53 }
 0x51f   :  { %v1105_v5 = vmul.f32 %v2226_v11, %v2226_v11  ;;  %v1106_v6 = vmul.f32 %v2228_v12, %v2228_v12  ;;  %v1107_v7 = vmul.f32 %v1091_v13, %v1091_v13  ;;  %v1108_v47 = vmul.f32 %v1092_v14, %v1092_v14 }
 0x520   :  { %v1109_v48 = vmul.f32 %v2230_v15, %v2230_v15  ;;  %v1110_v19 = vmul.f32 %v2232_v16, %v2232_v16  ;;  %v1111_v55 = vmul.f32 %v2234_v17, %v2234_v17  ;;  %v1112_v57 = vmul.f32 %v1096_v39, %v1096_v39 }
 0x521   :  { %v1121_v46 = vadd.f32 %v1106_v6, %v1105_v5  ;;  %v1113_v59 = vmul.f32 %v2236_v40, %v2236_v40  ;;  %v1114_v61 = vmul.f32 %v2238_v41, %v2238_v41  ;;  %v1115_v63 = vmul.f32 %v2240_v42, %v2240_v42 }
 0x522   :  { %v1116_v52 = vmul.f32 %v2242_v43, %v2242_v43  ;;  %v1117_v38 = vmul.f32 %v2244_v44, %v2244_v44  ;;  %v1118_v22 = vmul.f32 %v2246_v3, %v2246_v3  ;;  %v1119_v24 = vmul.f32 %v1103_v45, %v1103_v45 }
 0x523   :  { %v1122_v8 = vadd.f32 %v1121_v46, %v1107_v7  ;;  %v1120_v26 = vmul.f32 %v2248_v4, %v2248_v4 }
 0x525   :  { %v1123_v18 = vadd.f32 %v1122_v8, %v1108_v47 }
 0x527   :  { %v1124_v20 = vadd.f32 %v1123_v18, %v1109_v48 }
 0x529   :  { %v1125_v56 = vadd.f32 %v1124_v20, %v1110_v19 }
 0x52b   :  { %v1126_v58 = vadd.f32 %v1125_v56, %v1111_v55 }
 0x52d   :  { %v1127_v60 = vadd.f32 %v1126_v58, %v1112_v57 }
 0x52f   :  { %v1128_v62 = vadd.f32 %v1127_v60, %v1113_v59 }
 0x531   :  { %v1129_v0 = vadd.f32 %v1128_v62, %v1114_v61 }
 0x533   :  { %v1130_v1 = vadd.f32 %v1129_v0, %v1115_v63 }
 0x535   :  { %v1131_v21 = vadd.f32 %v1130_v1, %v1116_v52 }
 0x537   :  { %v1132_v23 = vadd.f32 %v1131_v21, %v1117_v38 }
 0x539   :  { %v1133_v25 = vadd.f32 %v1132_v23, %v1118_v22 }
 0x53b   :  { %v1134_v27 = vadd.f32 %v1133_v25, %v1119_v24 }
 0x53d   :  { %v1135_v28 = vadd.f32 %v1134_v27, %v1120_v26 }
 0x53f   :  { %v1136_v30 = vrot.slane %v1135_v28, 4 }
 0x541   :  { %v1137_v31 = vadd.f32 %v1136_v30, %v1135_v28 }
 0x543   :  { %v1138_v33 = vrot.slane %v1137_v31, 2 }
 0x545   :  { %v1139_v34 = vadd.f32 %v1138_v33, %v1137_v31 }
 0x547   :  { %v1140_v35 = vrot.slane %v1139_v34, 1 }
 0x549   :  { %v1141_v36 = vadd.f32 %v1140_v35, %v1139_v34 }
 0x54b   :  { %v1142_v37 = vmul.f32 0.0078125, %v1141_v36 }
 0x54d   :  { %v1143_v54 = vadd.f32 1e-05, %v1142_v37 }
 0x54f   :  { %1897 = vrsqrt.f32 %v1143_v54 }
 0x559   :  { %v1898_v49 = vpop.eup %1897 }
 0x55a   :  { %v1145_v9 = vmul.f32 %v1898_v49, %v1065_v2 }
 0x55c   :  { %v1149_v10 = vrot.slane %v1145_v9, %v2126_v32 }
 0x55e   :  { %v1164_v53 = vmul.f32 %v1149_v10, %v1103_v45  ;;  %v1152_v5 = vmul.f32 %v1149_v10, %v1091_v13  ;;  %v1150_v6 = vmul.f32 %v1149_v10, %v2226_v11  ;;  %v1153_v7 = vmul.f32 %v1149_v10, %v1092_v14 }
 0x55f   :  { %v1151_v46 = vmul.f32 %v1149_v10, %v2228_v12  ;;  %v1155_v47 = vmul.f32 %v1149_v10, %v2232_v16  ;;  %v1157_v8 = vmul.f32 %v1149_v10, %v1096_v39  ;;  %v1154_v29 = vmul.f32 %v1149_v10, %v2230_v15 }
 0x560   :  { %v1172_v48 = vadd.f32 %v1407_v51, %v1152_v5  ;;  %v1170_v18 = vadd.f32 %v1407_v51, %v1150_v6  ;;  %v1173_v45 = vadd.f32 %v1407_v51, %v1153_v7  ;;  %v1159_v14 = vmul.f32 %v1149_v10, %v2238_v41 }
 0x561   :  { %v1171_v11 = vadd.f32 %v1407_v51, %v1151_v46  ;;  %v1161_v12 = vmul.f32 %v1149_v10, %v2242_v43  ;;  %v1156_v16 = vmul.f32 %v1149_v10, %v2234_v17  ;;  %v1163_v39 = vmul.f32 %v1149_v10, %v2246_v3 }
 0x562   :  { %v1193_v32 = vsel %vm1188_vm0, %v1172_v48, -inf  ;;  %v1191_v13 = vsel %vm1188_vm0, %v1170_v18, -inf  ;;  %v1165_v15 = vmul.f32 %v1149_v10, %v2248_v4  ;;  %v1194_v19 = vsel %vm1188_vm0, %v1173_v45, -inf }
 0x563   :  { %1211 = vmax.xlane.f32.xlu1 %v1193_v32  ;;  %1207 = vmax.xlane.f32.xlu0 %v1191_v13  ;;  %v1192_v20 = vsel %vm1188_vm0, %v1171_v11, -inf  ;;  %v1175_v55 = vadd.f32 %v1407_v51, %v1155_v47  ;;  %v1174_v56 = vadd.f32 %v1407_v51, %v1154_v29  ;;  %v1177_v57 = vadd.f32 %v1407_v51, %v1157_v8 }
 0x564   :  { %v1176_v43 = vadd.f32 %v1407_v51, %v1156_v16  ;;  %v1158_v3 = vmul.f32 %v1149_v10, %v2236_v40  ;;  %v1179_v59 = vadd.f32 %v1407_v51, %v1159_v14  ;;  %v1160_v61 = vmul.f32 %v1149_v10, %v2240_v42 }
 0x565   :  { %v1196_v41 = vsel %vm1188_vm0, %v1175_v55, -inf  ;;  %v1195_v17 = vsel %vm1188_vm0, %v1174_v56, -inf  ;;  %v1198_v4 = vsel %vm1188_vm0, %v1177_v57, -inf  ;;  %v1162_v62 = vmul.f32 %v1149_v10, %v2244_v44 }
 0x566   :  { %v1197_v58 = vsel %vm1188_vm0, %v1176_v43, -inf  ;;  %v1178_v60 = vadd.f32 %v1407_v51, %v1158_v3  ;;  %v1200_v63 = vsel %vm1188_vm0, %v1179_v59, -inf  ;;  %v2311_v0 = vadd.f32 %v1407_v51, %v1161_v12 }
 0x567   :  { %1213 = vmax.xlane.f32.xlu1 %v1194_v19  ;;  %1209 = vmax.xlane.f32.xlu0 %v1192_v20  ;;  %v2313_v52 = vadd.f32 %v1407_v51, %v1160_v61  ;;  %v2321_v1 = vadd.f32 %v1407_v51, %v1163_v39  ;;  %v2323_v38 = vadd.f32 %v1407_v51, %v1162_v62 }
 0x568   :  { %v1199_v40 = vsel %vm1188_vm0, %v1178_v60, -inf  ;;  %v1202_v42 = vsel %vm1188_vm0, %v2311_v0, -inf  ;;  %v2331_v23 = vadd.f32 %v1407_v51, %v1165_v15  ;;  %v2333_v24 = vadd.f32 %v1407_v51, %v1164_v53 }
 0x569   :  { %v1201_v44 = vsel %vm1188_vm0, %v2313_v52, -inf  ;;  %v1204_v21 = vsel %vm1188_vm0, %v2321_v1, -inf  ;;  %v1203_v22 = vsel %vm1188_vm0, %v2323_v38, -inf }
 0x56a   :  { %v1206_v25 = vsel %vm1188_vm0, %v2331_v23, -inf  ;;  %v1205_v26 = vsel %vm1188_vm0, %v2333_v24, -inf }
 0x56b   :  { %1217 = vmax.xlane.f32.xlu1 %v1196_v41  ;;  %1215 = vmax.xlane.f32.xlu0 %v1195_v17 }
 0x56f   :  { %1221 = vmax.xlane.f32.xlu1 %v1198_v4  ;;  %1219 = vmax.xlane.f32.xlu0 %v1197_v58 }
 0x573   :  { %1225 = vmax.xlane.f32.xlu1 %v1200_v63  ;;  %1223 = vmax.xlane.f32.xlu0 %v1199_v40 }
 0x577   :  { %1229 = vmax.xlane.f32.xlu1 %v1202_v42  ;;  %1227 = vmax.xlane.f32.xlu0 %v1201_v44 }
 0x57b   :  { %1233 = vmax.xlane.f32.xlu1 %v1204_v21  ;;  %1231 = vmax.xlane.f32.xlu0 %v1203_v22 }
 0x57f   :  { %1237 = vmax.xlane.f32.xlu1 %v1206_v25  ;;  %1235 = vmax.xlane.f32.xlu0 %v1205_v26 }
 0x5f0   :  { %v1212_v27 = vpop.xlane.xlu1 %1211  ;;  %v1208_v28 = vpop.xlane.xlu0 %1207 }
 0x5f1   :  { %v2341_v30 = vsub.f32 %v1172_v48, %v1212_v27  ;;  %v2343_v31 = vsub.f32 %v1170_v18, %v1208_v28 }
 0x5f3   :  { %v1255_v33 = vmul.f32 1.442695, %v2343_v31  ;;  %v1259_v34 = vmul.f32 1.442695, %v2341_v30 }
 0x5f4   :  { %v1214_v35 = vpop.xlane.xlu1 %1213  ;;  %v1210_v36 = vpop.xlane.xlu0 %1209 }
 0x5f5   :  { %v2347_v37 = vsub.f32 %v1173_v45, %v1214_v35  ;;  %v2349_v54 = vsub.f32 %v1171_v11, %v1210_v36  ;;  %1899 = vpow2.f32 %v1255_v33 }
 0x5f6   :  { %1901 = vpow2.f32 %v1259_v34 }
 0x5f7   :  { %v1257_v2 = vmul.f32 1.442695, %v2349_v54  ;;  %v1261_v49 = vmul.f32 1.442695, %v2347_v37 }
 0x5f8   :  { %v1218_v9 = vpop.xlane.xlu1 %1217  ;;  %v1216_v10 = vpop.xlane.xlu0 %1215 }
 0x5f9   :  { %v2353_v51 = vsub.f32 %v1175_v55, %v1218_v9  ;;  %v2355_v53 = vsub.f32 %v1174_v56, %v1216_v10  ;;  %1903 = vpow2.f32 %v1257_v2 }
 0x5fa   :  { %1905 = vpow2.f32 %v1261_v49 }
 0x5fb   :  { %v1263_v5 = vmul.f32 1.442695, %v2355_v53  ;;  %v1265_v6 = vmul.f32 1.442695, %v2353_v51 }
 0x5fc   :  { %v1222_v7 = vpop.xlane.xlu1 %1221  ;;  %v1220_v46 = vpop.xlane.xlu0 %1219 }
 0x5fd   :  { %v2359_v47 = vsub.f32 %v1177_v57, %v1222_v7  ;;  %v2361_v8 = vsub.f32 %v1176_v43, %v1220_v46  ;;  %1907 = vpow2.f32 %v1263_v5 }
 0x5fe   :  { %1909 = vpow2.f32 %v1265_v6 }
 0x5ff   :  { %v1267_v48 = vmul.f32 1.442695, %v2361_v8  ;;  %v1900_v18 = vpop.eup %1899  ;;  %v1269_v29 = vmul.f32 1.442695, %v2359_v47 }
 0x600   :  { %v1226_v32 = vpop.xlane.xlu1 %1225  ;;  %v1224_v13 = vpop.xlane.xlu0 %1223  ;;  %v1287_v14 = vsel %vm1188_vm0, %v1900_v18, 0.0 }
 0x601   :  { %v2365_v45 = vsub.f32 %v1179_v59, %v1226_v32  ;;  %v2367_v11 = vsub.f32 %v1178_v60, %v1224_v13  ;;  %v1902_v12 = vpop.eup %1901  ;;  %1911 = vpow2.f32 %v1267_v48  ;;  %1303 = vadd.xlane.f32.xlu0 %v1287_v14 }
 0x602   :  { %1913 = vpow2.f32 %v1269_v29  ;;  %v1289_v57 = vsel %vm1188_vm0, %v1902_v12, 0.0 }
 0x603   :  { %v1271_v16 = vmul.f32 1.442695, %v2367_v11  ;;  %v1904_v39 = vpop.eup %1903  ;;  %v1273_v15 = vmul.f32 1.442695, %v2365_v45 }
 0x604   :  { %v1230_v19 = vpop.xlane.xlu1 %1229  ;;  %v1228_v20 = vpop.xlane.xlu0 %1227  ;;  %v1288_v41 = vsel %vm1188_vm0, %v1904_v39, 0.0 }
 0x605   :  { %v2374_v55 = vsub.f32 %v2311_v0, %v1230_v19  ;;  %v2377_v56 = vsub.f32 %v2313_v52, %v1228_v20  ;;  %v1906_v17 = vpop.eup %1905  ;;  %1915 = vpow2.f32 %v1271_v16  ;;  %1307 = vadd.xlane.f32.xlu0 %v1289_v57  ;;  %1305 = vadd.xlane.f32.xlu1 %v1288_v41 }
 0x606   :  { %1917 = vpow2.f32 %v1273_v15  ;;  %v1290_v62 = vsel %vm1188_vm0, %v1906_v17, 0.0 }
 0x607   :  { %v1275_v43 = vmul.f32 1.442695, %v2377_v56  ;;  %v1908_v3 = vpop.eup %1907  ;;  %v1277_v4 = vmul.f32 1.442695, %v2374_v55 }
 0x608   :  { %v1234_v58 = vpop.xlane.xlu1 %1233  ;;  %v1232_v59 = vpop.xlane.xlu0 %1231  ;;  %v1291_v63 = vsel %vm1188_vm0, %v1908_v3, 0.0 }
 0x609   :  { %v2386_v60 = vsub.f32 %v2321_v1, %v1234_v58  ;;  %v2389_v61 = vsub.f32 %v2323_v38, %v1232_v59  ;;  %v1910_v40 = vpop.eup %1909  ;;  %1919 = vpow2.f32 %v1275_v43  ;;  %1309 = vadd.xlane.f32.xlu1 %v1290_v62  ;;  %1311 = vadd.xlane.f32.xlu0 %v1291_v63 }
 0x60a   :  { %1921 = vpow2.f32 %v1277_v4  ;;  %v1292_v22 = vsel %vm1188_vm0, %v1910_v40, 0.0 }
 0x60b   :  { %v1279_v0 = vmul.f32 1.442695, %v2389_v61  ;;  %v1912_v52 = vpop.eup %1911  ;;  %v1281_v42 = vmul.f32 1.442695, %v2386_v60 }
 0x60c   :  { %v1238_v44 = vpop.xlane.xlu1 %1237  ;;  %v1236_v1 = vpop.xlane.xlu0 %1235  ;;  %v1293_v25 = vsel %vm1188_vm0, %v1912_v52, 0.0 }
 0x60d   :  { %v2398_v38 = vsub.f32 %v2331_v23, %v1238_v44  ;;  %v2401_v21 = vsub.f32 %v2333_v24, %v1236_v1  ;;  %v1914_v26 = vpop.eup %1913  ;;  %1923 = vpow2.f32 %v1279_v0  ;;  %1313 = vadd.xlane.f32.xlu1 %v1292_v22  ;;  %1315 = vadd.xlane.f32.xlu0 %v1293_v25 }
 0x60e   :  { %1925 = vpow2.f32 %v1281_v42  ;;  %v1294_v24 = vsel %vm1188_vm0, %v1914_v26, 0.0 }
 0x60f   :  { %v1283_v27 = vmul.f32 1.442695, %v2401_v21  ;;  %v1916_v28 = vpop.eup %1915  ;;  %v1285_v23 = vmul.f32 1.442695, %v2398_v38 }
 0x610   :  { %v1295_v33 = vsel %vm1188_vm0, %v1916_v28, 0.0  ;;  %v1918_v34 = vpop.eup %1917 }
 0x611   :  { %1927 = vpow2.f32 %v1283_v27  ;;  %1317 = vadd.xlane.f32.xlu1 %v1294_v24  ;;  %1319 = vadd.xlane.f32.xlu0 %v1295_v33  ;;  %v1296_v36 = vsel %vm1188_vm0, %v1918_v34, 0.0 }
 0x612   :  { %1929 = vpow2.f32 %v1285_v23 }
 0x613   :  { %v1920_v35 = vpop.eup %1919 }
 0x614   :  { %v1297_v2 = vsel %vm1188_vm0, %v1920_v35, 0.0  ;;  %v1922_v49 = vpop.eup %1921 }
 0x615   :  { %1321 = vadd.xlane.f32.xlu1 %v1296_v36  ;;  %1323 = vadd.xlane.f32.xlu0 %v1297_v2  ;;  %v1298_v10 = vsel %vm1188_vm0, %v1922_v49, 0.0 }
 0x617   :  { %v1924_v9 = vpop.eup %1923 }
 0x618   :  { %v1299_v5 = vsel %vm1188_vm0, %v1924_v9, 0.0  ;;  %v1926_v6 = vpop.eup %1925 }
 0x619   :  { %1325 = vadd.xlane.f32.xlu1 %v1298_v10  ;;  %1327 = vadd.xlane.f32.xlu0 %v1299_v5  ;;  %v1300_v46 = vsel %vm1188_vm0, %v1926_v6, 0.0 }
 0x61b   :  { %v1928_v7 = vpop.eup %1927 }
 0x61c   :  { %v1301_v48 = vsel %vm1188_vm0, %v1928_v7, 0.0  ;;  %v1930_v18 = vpop.eup %1929 }
 0x61d   :  { %1329 = vadd.xlane.f32.xlu1 %v1300_v46  ;;  %1331 = vadd.xlane.f32.xlu0 %v1301_v48  ;;  %v1302_v29 = vsel %vm1188_vm0, %v1930_v18, 0.0 }
 0x621   :  { %1333 = vadd.xlane.f32.xlu1 %v1302_v29 }
 0x68e   :  { %v1304_v32 = vpop.xlane.xlu0 %1303 }
 0x68f   :  { %1931 = vlog2.f32 %v1304_v32 }
 0x692   :  { %v1306_v13 = vpop.xlane.xlu1 %1305  ;;  %v1308_v14 = vpop.xlane.xlu0 %1307 }
 0x693   :  { %1933 = vlog2.f32 %v1306_v13 }
 0x694   :  { %1935 = vlog2.f32 %v1308_v14 }
 0x696   :  { %v1310_v12 = vpop.xlane.xlu1 %1309  ;;  %v1312_v16 = vpop.xlane.xlu0 %1311 }
 0x697   :  { %1937 = vlog2.f32 %v1310_v12 }
 0x698   :  { %1939 = vlog2.f32 %v1312_v16 }
 0x699   :  { %v1932_v39 = vpop.eup %1931 }
 0x69a   :  { %v1336_v15 = vmul.f32 0.6931472, %v1932_v39  ;;  %v1314_v19 = vpop.xlane.xlu1 %1313  ;;  %v1316_v20 = vpop.xlane.xlu0 %1315 }
 0x69b   :  { %1941 = vlog2.f32 %v1314_v19 }
 0x69c   :  { %v1367_v57 = vsub.f32 %v2343_v31, %v1336_v15  ;;  %1943 = vlog2.f32 %v1316_v20 }
 0x69d   :  { %v1934_v50 = vpop.eup %1933 }
 0x69e   :  { %v1936_v41 = vpop.eup %1935  ;;  %1383 = vst [vmem:[%s2493_s2] sm:$0xff] %v1367_v57  ;;  %v1338_v17 = vmul.f32 0.6931472, %v1934_v50  ;;  %v1318_v43 = vpop.xlane.xlu1 %1317 }
 0x69f   :  { %v1320_v3 = vpop.xlane.xlu0 %1319  ;;  %v1340_v4 = vmul.f32 0.6931472, %v1936_v41  ;;  %1945 = vlog2.f32 %v1318_v43 }
 0x6a0   :  { %v1368_v58 = vsub.f32 %v2349_v54, %v1338_v17  ;;  %1947 = vlog2.f32 %v1320_v3 }
 0x6a1   :  { %v1938_v59 = vpop.eup %1937  ;;  %v1369_v62 = vsub.f32 %v2341_v30, %v1340_v4 }
 0x6a2   :  { %v1940_v63 = vpop.eup %1939  ;;  %1384 = vst [vmem:[%s2493_s2 + $0x8] sm:$0xff] %v1368_v58  ;;  %v1342_v31 = vmul.f32 0.6931472, %v1938_v59  ;;  %v1322_v40 = vpop.xlane.xlu1 %1321 }
 0x6a3   :  { %v1324_v0 = vpop.xlane.xlu0 %1323  ;;  %1385 = vst [vmem:[%s2493_s2 + $0x10] sm:$0xff] %v1369_v62  ;;  %v1344_v52 = vmul.f32 0.6931472, %v1940_v63  ;;  %1949 = vlog2.f32 %v1322_v40 }
 0x6a4   :  { %v1370_v54 = vsub.f32 %v2347_v37, %v1342_v31  ;;  %1951 = vlog2.f32 %v1324_v0 }
 0x6a5   :  { %v1942_v42 = vpop.eup %1941  ;;  %v1371_v30 = vsub.f32 %v2355_v53, %v1344_v52 }
 0x6a6   :  { %v1944_v44 = vpop.eup %1943  ;;  %1386 = vst [vmem:[%s2493_s2 + $0x18] sm:$0xff] %v1370_v54  ;;  %v1346_v1 = vmul.f32 0.6931472, %v1942_v42  ;;  %v1326_v22 = vpop.xlane.xlu1 %1325 }
 0x6a7   :  { %v1328_v25 = vpop.xlane.xlu0 %1327  ;;  %1387 = vst [vmem:[%s2493_s2 + $0x20] sm:$0xff] %v1371_v30  ;;  %v1348_v26 = vmul.f32 0.6931472, %v1944_v44  ;;  %1953 = vlog2.f32 %v1326_v22 }
 0x6a8   :  { %v1372_v37 = vsub.f32 %v2353_v51, %v1346_v1  ;;  %1955 = vlog2.f32 %v1328_v25 }
 0x6a9   :  { %v1946_v27 = vpop.eup %1945  ;;  %v1373_v53 = vsub.f32 %v2361_v8, %v1348_v26 }
 0x6aa   :  { %v1948_v28 = vpop.eup %1947  ;;  %1388 = vst [vmem:[%s2493_s2 + $0x28] sm:$0xff] %v1372_v37  ;;  %v1350_v23 = vmul.f32 0.6931472, %v1946_v27  ;;  %v1330_v24 = vpop.xlane.xlu1 %1329 }
 0x6ab   :  { %v1332_v33 = vpop.xlane.xlu0 %1331  ;;  %1389 = vst [vmem:[%s2493_s2 + $0x30] sm:$0xff] %v1373_v53  ;;  %v1352_v34 = vmul.f32 0.6931472, %v1948_v28  ;;  %1957 = vlog2.f32 %v1330_v24 }
 0x6ac   :  { %v1374_v51 = vsub.f32 %v2359_v47, %v1350_v23  ;;  %1959 = vlog2.f32 %v1332_v33 }
 0x6ad   :  { %v1950_v35 = vpop.eup %1949  ;;  %v1375_v8 = vsub.f32 %v2367_v11, %v1352_v34 }
 0x6ae   :  { %v1952_v36 = vpop.eup %1951  ;;  %1390 = vst [vmem:[%s2493_s2 + $0x38] sm:$0xff] %v1374_v51  ;;  %v1354_v2 = vmul.f32 0.6931472, %v1950_v35  ;;  %v1334_v49 = vpop.xlane.xlu1 %1333 }
 0x6af   :  { %1391 = vst [vmem:[%s2493_s2 + $0x40] sm:$0xff] %v1375_v8  ;;  %v1356_v9 = vmul.f32 0.6931472, %v1952_v36  ;;  %1961 = vlog2.f32 %v1334_v49 }
 0x6b0   :  { %v1376_v10 = vsub.f32 %v2365_v45, %v1354_v2 }
 0x6b1   :  { %v1954_v47 = vpop.eup %1953  ;;  %v1377_v5 = vsub.f32 %v2377_v56, %v1356_v9 }
 0x6b2   :  { %v1956_v6 = vpop.eup %1955  ;;  %1392 = vst [vmem:[%s2493_s2 + $0x48] sm:$0xff] %v1376_v10  ;;  %v1358_v11 = vmul.f32 0.6931472, %v1954_v47 }
 0x6b3   :  { %1393 = vst [vmem:[%s2493_s2 + $0x50] sm:$0xff] %v1377_v5  ;;  %v1360_v7 = vmul.f32 0.6931472, %v1956_v6 }
 0x6b4   :  { %v1378_v46 = vsub.f32 %v2374_v55, %v1358_v11 }
 0x6b5   :  { %v1958_v48 = vpop.eup %1957  ;;  %v1379_v18 = vsub.f32 %v2389_v61, %v1360_v7 }
 0x6b6   :  { %v1960_v45 = vpop.eup %1959  ;;  %1394 = vst [vmem:[%s2493_s2 + $0x58] sm:$0xff] %v1378_v46  ;;  %v1362_v56 = vmul.f32 0.6931472, %v1958_v48 }
 0x6b7   :  { %1395 = vst [vmem:[%s2493_s2 + $0x60] sm:$0xff] %v1379_v18  ;;  %v1364_v29 = vmul.f32 0.6931472, %v1960_v45 }
 0x6b8   :  { %v1380_v32 = vsub.f32 %v2386_v60, %v1362_v56 }
 0x6b9   :  { %v1962_v13 = vpop.eup %1961  ;;  %v1381_v14 = vsub.f32 %v2401_v21, %v1364_v29 }
 0x6ba   :  { %1396 = vst [vmem:[%s2493_s2 + $0x68] sm:$0xff] %v1380_v32  ;;  %v1366_v55 = vmul.f32 0.6931472, %v1962_v13 }
 0x6bb   :  { %1397 = vst [vmem:[%s2493_s2 + $0x70] sm:$0xff] %v1381_v14 }
 0x6bc   :  { %v1382_v61 = vsub.f32 %v2398_v38, %v1366_v55 }
 0x6be   :  { %1398 = vst [vmem:[%s2493_s2 + $0x78] sm:$0xff] %v1382_v61 }
 0x6bf   :  { %1403 = vsyncpa [#allocation3], 1 }

</bundles_post_ra>
